<compile_context>
chip_gen: v5e
topology: v5e:2x2
jax: 0.10.0
libtpu: 0.0.40
codegen_flags: <defaults>
</compile_context>

<pallas_src>
import jax
import jax.numpy as jnp
from jax.experimental import pallas as pl
from jax.experimental.pallas import tpu as pltpu


# Logical / padded dimensions.
DIN = 784        # input features (block covers the full dim; no padding needed)
H = 200          # logical hidden width
DOUT = 10        # logical output width
H_PAD = 256      # hidden padded to a clean 2x128-lane shape
DOUT_PAD = 128   # output padded to one full lane group (lane-dense stores)


def mnist_2nn_kernel(x_ref, w1_ref, b1_ref, w2_ref, b2_ref, w3_ref, b3_ref, o_ref):
    # Fused 3-layer MLP on one (tb, 784) batch tile. Weights are VMEM-resident
    # (constant block index) and in bf16; accumulation is f32 on the MXU.
    x = x_ref[...]                                                        # (tb, 784) bf16

    h1 = jnp.dot(x, w1_ref[...], preferred_element_type=jnp.float32) + b1_ref[...]
    h1 = jnp.maximum(h1, 0.0).astype(jnp.bfloat16)                        # (tb, 256)

    h2 = jnp.dot(h1, w2_ref[...], preferred_element_type=jnp.float32) + b2_ref[...]
    h2 = jnp.maximum(h2, 0.0).astype(jnp.bfloat16)                        # (tb, 256)

    h3 = jnp.dot(h2, w3_ref[...], preferred_element_type=jnp.float32) + b3_ref[...]
    o_ref[...] = h3.astype(o_ref.dtype)                                   # (tb, 128)


def _round_up(x, m):
    return (x + m - 1) // m * m


def _pad_params(params):
    """Zero-pad params to lane-aligned shapes; weights -> bf16, biases stay f32."""
    w1, b1 = params["w1"], params["b1"]
    w2, b2 = params["w2"], params["b2"]
    w3, b3 = params["w3"], params["b3"]

    w1p = jnp.pad(w1, ((0, 0), (0, H_PAD - w1.shape[1])))
    b1p = jnp.pad(b1, ((0, 0), (0, H_PAD - b1.shape[1])))
    w2p = jnp.pad(w2, ((0, H_PAD - w2.shape[0]), (0, H_PAD - w2.shape[1])))
    b2p = jnp.pad(b2, ((0, 0), (0, H_PAD - b2.shape[1])))
    w3p = jnp.pad(w3, ((0, H_PAD - w3.shape[0]), (0, DOUT_PAD - w3.shape[1])))
    b3p = jnp.pad(b3, ((0, 0), (0, DOUT_PAD - b3.shape[1])))

    return (w1p.astype(jnp.bfloat16), b1p.astype(jnp.float32),
            w2p.astype(jnp.bfloat16), b2p.astype(jnp.float32),
            w3p.astype(jnp.bfloat16), b3p.astype(jnp.float32))


def mnist_2nn_forward(x, params, *, tb=512):
    """x: (B, 784) float32. params: dict of w1,b1,w2,b2,w3,b3 (w: (in,out), b: (1,out)).

    Returns (B, 10) float32 logits, numerically matching the PyTorch module's forward
    (bf16 matmul inputs, f32 accumulation).
    """
    B, Din = x.shape
    assert Din == DIN
    Dout = params["w3"].shape[1]

    # Batch tile: as large as requested but never larger than the (8-aligned) batch.
    tb_eff = _round_up(min(tb, _round_up(B, 8)), 8)
    B_pad = _round_up(B, tb_eff)

    x_p = x if B_pad == B else jnp.pad(x, ((0, B_pad - B), (0, 0)))
    x_p = x_p.astype(jnp.bfloat16)

    w1, b1, w2, b2, w3, b3 = _pad_params(params)

    grid = (B_pad // tb_eff,)

    def batch_map(i):
        return (i, 0)

    def full_map(i):
        return (0, 0)

    out_padded = pl.pallas_call(
        mnist_2nn_kernel,
        out_shape=jax.ShapeDtypeStruct((B_pad, DOUT_PAD), jnp.float32),
        grid_spec=pltpu.PrefetchScalarGridSpec(
            num_scalar_prefetch=0,
            grid=grid,
            in_specs=[
                pl.BlockSpec((tb_eff, DIN), batch_map),     # x tile (bf16)
                pl.BlockSpec((DIN, H_PAD), full_map),       # w1 (resident)
                pl.BlockSpec((1, H_PAD), full_map),         # b1
                pl.BlockSpec((H_PAD, H_PAD), full_map),     # w2
                pl.BlockSpec((1, H_PAD), full_map),         # b2
                pl.BlockSpec((H_PAD, DOUT_PAD), full_map),  # w3 (padded to 128 out lanes)
                pl.BlockSpec((1, DOUT_PAD), full_map),      # b3
            ],
            out_specs=pl.BlockSpec((tb_eff, DOUT_PAD), batch_map),
        ),
        compiler_params=pltpu.CompilerParams(
            dimension_semantics=("parallel",),
        ),
    )(x_p, w1, b1, w2, b2, w3, b3)

    # Slice away batch padding and the zero-padded output lanes.
    return out_padded[:B, :Dout]


def init_params(key):
    """Deterministic synthetic parameters matching the PyTorch module's shapes."""
    k1, k2, k3, k4, k5, k6 = jax.random.split(key, 6)
    scale = 0.05
    return {
        # stored as (in_features, out_features)  -- transpose of nn.Linear's (out, in)
        "w1": scale * jax.random.normal(k1, (DIN, H), jnp.float32),
        "b1": scale * jax.random.normal(k2, (1, H), jnp.float32),
        "w2": scale * jax.random.normal(k3, (H, H), jnp.float32),
        "b2": scale * jax.random.normal(k4, (1, H), jnp.float32),
        "w3": scale * jax.random.normal(k5, (H, DOUT), jnp.float32),
        "b3": scale * jax.random.normal(k6, (1, DOUT), jnp.float32),
    }


def reference_forward(x, params):
    h1 = jnp.maximum(x @ params["w1"] + params["b1"], 0.0)
    h2 = jnp.maximum(h1 @ params["w2"] + params["b2"], 0.0)
    return h2 @ params["w3"] + params["b3"]


if __name__ == "__main__":
    key = jax.random.PRNGKey(0)
    kx, kp = jax.random.split(key)

    B = 256                      # small demo batch; tb=128 -> 2 grid steps (pipelined)
    x = jax.random.normal(kx, (B, DIN), jnp.float32)
    params = init_params(kp)

    out = mnist_2nn_forward(x, params, tb=128)
    out = jax.block_until_ready(out)

    ref = reference_forward(x, params)
    assert out.shape == (B, DOUT)
    max_err = float(jnp.max(jnp.abs(out - ref)))
    # bf16 matmul inputs with f32 accumulation -> loosened tolerance vs. the f32 reference.
    assert jnp.allclose(out, ref, atol=5e-2, rtol=5e-2), f"max abs err = {max_err}"

    print("KERNEL_OK")
</pallas_src>

<mosaic_0001>
module attributes {stable_mosaic.version = 11 : i64} {
  func.func @mnist_2nn_kernel(%arg0: i32, %arg1: memref<128x784xbf16, #tpu.memory_space<vmem>>, %arg2: memref<784x256xbf16, #tpu.memory_space<vmem>>, %arg3: memref<1x256xf32, #tpu.memory_space<vmem>>, %arg4: memref<256x256xbf16, #tpu.memory_space<vmem>>, %arg5: memref<1x256xf32, #tpu.memory_space<vmem>>, %arg6: memref<256x128xbf16, #tpu.memory_space<vmem>>, %arg7: memref<1x128xf32, #tpu.memory_space<vmem>>, %arg8: memref<128x128xf32, #tpu.memory_space<vmem>>) attributes {dimension_semantics = [#tpu.dimension_semantics<parallel>], iteration_bounds = array<i64: 2>, scalar_prefetch = 0 : i64, scratch_operands = 0 : i64, tpu.core_type = #tpu.core_type<tc>, window_params = [{transform_indices = @transform_0, window_bounds = array<i64: 128, 784>}, {pipeline_mode = #tpu.pipeline_mode<synchronous>, transform_indices = @transform_1, window_bounds = array<i64: 784, 256>}, {pipeline_mode = #tpu.pipeline_mode<synchronous>, transform_indices = @transform_2, window_bounds = array<i64: 1, 256>}, {pipeline_mode = #tpu.pipeline_mode<synchronous>, transform_indices = @transform_3, window_bounds = array<i64: 256, 256>}, {pipeline_mode = #tpu.pipeline_mode<synchronous>, transform_indices = @transform_4, window_bounds = array<i64: 1, 256>}, {pipeline_mode = #tpu.pipeline_mode<synchronous>, transform_indices = @transform_5, window_bounds = array<i64: 256, 128>}, {pipeline_mode = #tpu.pipeline_mode<synchronous>, transform_indices = @transform_6, window_bounds = array<i64: 1, 128>}, {transform_indices = @transform_7, window_bounds = array<i64: 128, 128>}]} {
    %c0 = arith.constant 0 : index
    %c0_0 = arith.constant 0 : index
    %0 = vector.load %arg1[%c0, %c0_0] : memref<128x784xbf16, #tpu.memory_space<vmem>>, vector<128x784xbf16>
    %c0_1 = arith.constant 0 : index
    %c0_2 = arith.constant 0 : index
    %1 = vector.load %arg2[%c0_1, %c0_2] : memref<784x256xbf16, #tpu.memory_space<vmem>>, vector<784x256xbf16>
    %cst = arith.constant dense<0.000000e+00> : vector<128x256xf32>
    %2 = tpu.matmul %0, %1, %cst {dimension_numbers = #tpu.dot_dimension_numbers<[1], [0], [0], [1], [0, 0, 1, 1], [], []>} : vector<128x784xbf16>, vector<784x256xbf16>, vector<128x256xf32> -> vector<128x256xf32>
    %c0_3 = arith.constant 0 : index
    %c0_4 = arith.constant 0 : index
    %3 = vector.load %arg3[%c0_3, %c0_4] : memref<1x256xf32, #tpu.memory_space<vmem>>, vector<1x256xf32>
    %4 = vector.broadcast %3 : vector<1x256xf32> to vector<128x256xf32>
    %5 = arith.addf %2, %4 : vector<128x256xf32>
    %cst_5 = arith.constant 0.000000e+00 : f32
    %6 = vector.broadcast %cst_5 : f32 to vector<128x256xf32>
    %7 = arith.maximumf %5, %6 : vector<128x256xf32>
    %8 = arith.truncf %7 : vector<128x256xf32> to vector<128x256xbf16>
    %c0_6 = arith.constant 0 : index
    %c0_7 = arith.constant 0 : index
    %9 = vector.load %arg4[%c0_6, %c0_7] : memref<256x256xbf16, #tpu.memory_space<vmem>>, vector<256x256xbf16>
    %cst_8 = arith.constant dense<0.000000e+00> : vector<128x256xf32>
    %10 = tpu.matmul %8, %9, %cst_8 {dimension_numbers = #tpu.dot_dimension_numbers<[1], [0], [0], [1], [0, 0, 1, 1], [], []>} : vector<128x256xbf16>, vector<256x256xbf16>, vector<128x256xf32> -> vector<128x256xf32>
    %c0_9 = arith.constant 0 : index
    %c0_10 = arith.constant 0 : index
    %11 = vector.load %arg5[%c0_9, %c0_10] : memref<1x256xf32, #tpu.memory_space<vmem>>, vector<1x256xf32>
    %12 = vector.broadcast %11 : vector<1x256xf32> to vector<128x256xf32>
    %13 = arith.addf %10, %12 : vector<128x256xf32>
    %cst_11 = arith.constant 0.000000e+00 : f32
    %14 = vector.broadcast %cst_11 : f32 to vector<128x256xf32>
    %15 = arith.maximumf %13, %14 : vector<128x256xf32>
    %16 = arith.truncf %15 : vector<128x256xf32> to vector<128x256xbf16>
    %c0_12 = arith.constant 0 : index
    %c0_13 = arith.constant 0 : index
    %17 = vector.load %arg6[%c0_12, %c0_13] : memref<256x128xbf16, #tpu.memory_space<vmem>>, vector<256x128xbf16>
    %cst_14 = arith.constant dense<0.000000e+00> : vector<128x128xf32>
    %18 = tpu.matmul %16, %17, %cst_14 {dimension_numbers = #tpu.dot_dimension_numbers<[1], [0], [0], [1], [0, 0, 1, 1], [], []>} : vector<128x256xbf16>, vector<256x128xbf16>, vector<128x128xf32> -> vector<128x128xf32>
    %c0_15 = arith.constant 0 : index
    %c0_16 = arith.constant 0 : index
    %19 = vector.load %arg7[%c0_15, %c0_16] : memref<1x128xf32, #tpu.memory_space<vmem>>, vector<1x128xf32>
    %20 = vector.broadcast %19 : vector<1x128xf32> to vector<128x128xf32>
    %21 = arith.addf %18, %20 : vector<128x128xf32>
    %c0_17 = arith.constant 0 : index
    %c0_18 = arith.constant 0 : index
    %22 = vector.load %arg8[%c0_17, %c0_18] : memref<128x128xf32, #tpu.memory_space<vmem>>, vector<128x128xf32>
    tpu.vector_store %arg8[%c0_17, %c0_18], %21 {strides = array<i32>} : memref<128x128xf32, #tpu.memory_space<vmem>>, vector<128x128xf32>,
    return
  }
  func.func @transform_0(%arg0: i32) -> (i32, i32) {
    %c0_i32 = arith.constant 0 : i32
    %c0_i32_0 = arith.constant 0 : i32
    return %arg0, %c0_i32 : i32, i32
  }
  func.func @transform_1(%arg0: i32) -> (i32, i32) {
    %c0_i32 = arith.constant 0 : i32
    %c0_i32_0 = arith.constant 0 : i32
    %c0_i32_1 = arith.constant 0 : i32
    return %c0_i32, %c0_i32_0 : i32, i32
  }
  func.func @transform_2(%arg0: i32) -> (i32, i32) {
    %c0_i32 = arith.constant 0 : i32
    %c0_i32_0 = arith.constant 0 : i32
    %c0_i32_1 = arith.constant 0 : i32
    return %c0_i32, %c0_i32_0 : i32, i32
  }
  func.func @transform_3(%arg0: i32) -> (i32, i32) {
    %c0_i32 = arith.constant 0 : i32
    %c0_i32_0 = arith.constant 0 : i32
    %c0_i32_1 = arith.constant 0 : i32
    return %c0_i32, %c0_i32_0 : i32, i32
  }
  func.func @transform_4(%arg0: i32) -> (i32, i32) {
    %c0_i32 = arith.constant 0 : i32
    %c0_i32_0 = arith.constant 0 : i32
    %c0_i32_1 = arith.constant 0 : i32
    return %c0_i32, %c0_i32_0 : i32, i32
  }
  func.func @transform_5(%arg0: i32) -> (i32, i32) {
    %c0_i32 = arith.constant 0 : i32
    %c0_i32_0 = arith.constant 0 : i32
    %c0_i32_1 = arith.constant 0 : i32
    return %c0_i32, %c0_i32_0 : i32, i32
  }
  func.func @transform_6(%arg0: i32) -> (i32, i32) {
    %c0_i32 = arith.constant 0 : i32
    %c0_i32_0 = arith.constant 0 : i32
    %c0_i32_1 = arith.constant 0 : i32
    return %c0_i32, %c0_i32_0 : i32, i32
  }
  func.func @transform_7(%arg0: i32) -> (i32, i32) {
    %c0_i32 = arith.constant 0 : i32
    %c0_i32_0 = arith.constant 0 : i32
    return %arg0, %c0_i32 : i32, i32
  }
}

</mosaic_0001>

<bundles_post_ra>
// kernel: tpu_custom_call.1
= control target key start
LH: loop header
LB: loop body
LE: loop exit
PB: predicated region body
PF: predicated region fallthrough
CT: control target
= control target key end

     0   :  { %12 = vsyncpa [#allocation3], 0  ;;  %s5512_s0 = inlined_call_operand.vmem [shape: bf16[256,784], index: 0, kind: input, shape index: {}]   ;;  %s5513_s1 = inlined_call_operand.vmem [shape: bf16[784,256], index: 1, kind: input, shape index: {}]   ;;  %s5514_s2 = inlined_call_operand.vmem [shape: f32[1,256], index: 2, kind: input, shape index: {}]   ;;  %s5515_s3 = inlined_call_operand.vmem [shape: bf16[256,256], index: 3, kind: input, shape index: {}]   ;;  %s5516_s4 = inlined_call_operand.vmem [shape: f32[1,256], index: 4, kind: input, shape index: {}]   ;;  %s5517_s5 = inlined_call_operand.vmem [shape: bf16[256,128], index: 5, kind: input, shape index: {}]   ;;  %s5518_s6 = inlined_call_operand.vmem [shape: f32[1,128], index: 6, kind: input, shape index: {}]   ;;  %s5519_s7 = inlined_call_operand.hbm [shape: f32[256,128], index: 7, kind: output, shape index: {}]  }
   0x1   :  { %14 = vsyncpa [#allocation3 + $0x1], 0  ;;  %s3936_s24 = smov 0   ;;  %s3938_s25 = smov 0  }
   0x2   :  { %s3940_s26 = smov 0   ;;  %s3942_s27 = smov 0  }
   0x3 LB: > { %s3957_s28 = sadd.s32 4294967295, %s3892_s27   ;;  %s2747_s29 = sadd.s32 4294967294, %s3892_s27   ;;  %s3892_s27 = sphi %s3942_s27, %s5579_s27   ;;  %s3888_s26 = sphi %s3940_s26, %s5578_s26   ;;  %s3884_s25 = sphi %s3938_s25, %s5577_s25   ;;  %s3880_s24 = sphi %s3936_s24, %s5576_s24  }
   0x4   : > { %s3961_s30 = sadd.s32 1, %s3892_s27   ;;  %s179_s8 = sadd.s32 1, %s3888_s26 }
   0x5   : > { %s176_s9 = ssub.s32 %s3892_s27, %s3961_s30  ;;  %p189_p0 = scmp.ne.s32.totalorder %s3888_s26, %s3884_s25 }
   0x6   : > { %p177_p1 = scmp.eq.s32.totalorder %s176_s9, 0  ;;  %p190_p2 = scmp.eq.s32.totalorder %s3957_s28, 1 }
   0x7   : > { %p195_p3 = scmp.ne.s32.totalorder %s3884_s25, %s3880_s24  ;;  %p196_p4 = scmp.eq.s32.totalorder %s2747_s29, 1 }
   0x8   : > { %s3972_s10 = scalar_select %p177_p1, %s3888_s26, %s179_s8  }
   0x9   : > { %p3974_p5 = por %p190_p2, %p189_p0  ;;  %p3978_p6 = por %p196_p4, %p195_p3 }
   0xa   : > { %p2750_p7 = scmp.ge.s32.totalorder %s3892_s27, 1  ;;  %p242_p8 = scmp.lt.s32.totalorder %s3892_s27, 3 }
   0xc   : > { %p243_p9 = pnand %p2750_p7, %p242_p8 }
   0xe   : > { %246 = sbr.rel (%p243_p9) target bundleno = 985 (0x3d9), region = 48 }
  0x13   : > { %v3036_v0 = vld [vmem:[%s5513_s1 + $0x70] sm:$0xf]  ;;  %v3654_v1 = vld [vmem:[%s5513_s1 + $0x74] sm:$0xf0]  ;;  %v3028_v11 = vld [vmem:[%s5513_s1 + $0x60] sm:$0xf] }
  0x14   : > { %v3100_v2 = vld [vmem:[%s5513_s1 + $0xf0] sm:$0xf]  ;;  %v3037_v3 = vor.u32 %v3654_v1, %v3036_v0  ;;  %v3670_v4 = vld [vmem:[%s5513_s1 + $0xf4] sm:$0xf0]  ;;  %v3652_v13 = vld [vmem:[%s5513_s1 + $0x64] sm:$0xf0] }
  0x15   : > { %v3164_v5 = vld [vmem:[%s5513_s1 + $0x170] sm:$0xf]  ;;  %v3686_v6 = vld [vmem:[%s5513_s1 + $0x174] sm:$0xf0]  ;;  %v3101_v7 = vor.u32 %v3670_v4, %v3100_v2  ;;  %v3092_v14 = vld [vmem:[%s5513_s1 + $0xe0] sm:$0xf]  ;;  %v3029_v16 = vor.u32 %v3652_v13, %v3028_v11 }
  0x16   : > { %v3165_v8 = vor.u32 %v3686_v6, %v3164_v5  ;;  %v3228_v9 = vld [vmem:[%s5513_s1 + $0x1f0] sm:$0xf]  ;;  %v3702_v10 = vld [vmem:[%s5513_s1 + $0x1f4] sm:$0xf0]  ;;  %1247 = vmatpush.bf16.msra.mxu0 %v3037_v3  ;;  %v3668_v15 = vld [vmem:[%s5513_s1 + $0xe4] sm:$0xf0] }
  0x17   : > { %v3229_v12 = vor.u32 %v3702_v10, %v3228_v9  ;;  %1296 = vmatpush.bf16.msra.mxu1 %v3101_v7  ;;  %v3093_v17 = vor.u32 %v3668_v15, %v3092_v14  ;;  %v3156_v18 = vld [vmem:[%s5513_s1 + $0x160] sm:$0xf]  ;;  %v3684_v19 = vld [vmem:[%s5513_s1 + $0x164] sm:$0xf0]  ;;  %v3020_v23 = vld [vmem:[%s5513_s1 + $0x50] sm:$0xf] }
  0x18   : > { %1345 = vmatpush.bf16.msra.mxu2 %v3165_v8  ;;  %v3220_v20 = vld [vmem:[%s5513_s1 + $0x1e0] sm:$0xf]  ;;  %v3157_v21 = vor.u32 %v3684_v19, %v3156_v18  ;;  %v3700_v22 = vld [vmem:[%s5513_s1 + $0x1e4] sm:$0xf0]  ;;  %v3650_v24 = vld [vmem:[%s5513_s1 + $0x54] sm:$0xf0] }
  0x19   : > { %1394 = vmatpush.bf16.msra.mxu3 %v3229_v12  ;;  %v3221_v25 = vor.u32 %v3700_v22, %v3220_v20  ;;  %v3084_v26 = vld [vmem:[%s5513_s1 + $0xd0] sm:$0xf]  ;;  %v3666_v27 = vld [vmem:[%s5513_s1 + $0xd4] sm:$0xf0]  ;;  %v3021_v29 = vor.u32 %v3650_v24, %v3020_v23  ;;  %v3012_v35 = vld [vmem:[%s5513_s1 + $0x40] sm:$0xf] }
  0x1a   : > { %v3148_v28 = vld [vmem:[%s5513_s1 + $0x150] sm:$0xf]  ;;  %1248 = vmatpush.bf16.msra.mxu0 %v3029_v16  ;;  %v3682_v30 = vld [vmem:[%s5513_s1 + $0x154] sm:$0xf0]  ;;  %v3085_v33 = vor.u32 %v3666_v27, %v3084_v26  ;;  %v3648_v36 = vld [vmem:[%s5513_s1 + $0x44] sm:$0xf0] }
  0x1b   : > { %v3212_v31 = vld [vmem:[%s5513_s1 + $0x1d0] sm:$0xf]  ;;  %v3698_v32 = vld [vmem:[%s5513_s1 + $0x1d4] sm:$0xf0]  ;;  %1297 = vmatpush.bf16.msra.mxu1 %v3093_v17  ;;  %v3149_v34 = vor.u32 %v3682_v30, %v3148_v28  ;;  %v3076_v37 = vld [vmem:[%s5513_s1 + $0xc0] sm:$0xf]  ;;  %v3013_v44 = vor.u32 %v3648_v36, %v3012_v35 }
  0x1c   : > { %1346 = vmatpush.bf16.msra.mxu2 %v3157_v21  ;;  %v3213_v38 = vor.u32 %v3698_v32, %v3212_v31  ;;  %v3664_v39 = vld [vmem:[%s5513_s1 + $0xc4] sm:$0xf0]  ;;  %v3140_v40 = vld [vmem:[%s5513_s1 + $0x140] sm:$0xf]  ;;  %v3004_v47 = vld [vmem:[%s5513_s1 + $0x30] sm:$0xf] }
  0x1d   : > { %1395 = vmatpush.bf16.msra.mxu3 %v3221_v25  ;;  %v3680_v41 = vld [vmem:[%s5513_s1 + $0x144] sm:$0xf0]  ;;  %v3204_v42 = vld [vmem:[%s5513_s1 + $0x1c0] sm:$0xf]  ;;  %v3077_v45 = vor.u32 %v3664_v39, %v3076_v37  ;;  %v3646_v48 = vld [vmem:[%s5513_s1 + $0x34] sm:$0xf0] }
  0x1e   : > { %v3696_v43 = vld [vmem:[%s5513_s1 + $0x1c4] sm:$0xf0]  ;;  %1249 = vmatpush.bf16.msra.mxu0 %v3021_v29  ;;  %v3141_v46 = vor.u32 %v3680_v41, %v3140_v40  ;;  %v3068_v49 = vld [vmem:[%s5513_s1 + $0xb0] sm:$0xf]  ;;  %v3662_v51 = vld [vmem:[%s5513_s1 + $0xb4] sm:$0xf0]  ;;  %v3005_v56 = vor.u32 %v3646_v48, %v3004_v47 }
  0x1f   : > { %1298 = vmatpush.bf16.msra.mxu1 %v3085_v33  ;;  %v3205_v50 = vor.u32 %v3696_v43, %v3204_v42  ;;  %v3132_v52 = vld [vmem:[%s5513_s1 + $0x130] sm:$0xf]  ;;  %v3678_v53 = vld [vmem:[%s5513_s1 + $0x134] sm:$0xf0]  ;;  %v3069_v57 = vor.u32 %v3662_v51, %v3068_v49  ;;  %v2996_v59 = vld [vmem:[%s5513_s1 + $0x20] sm:$0xf] }
  0x20   : > { %1347 = vmatpush.bf16.msra.mxu2 %v3149_v34  ;;  %v3196_v54 = vld [vmem:[%s5513_s1 + $0x1b0] sm:$0xf]  ;;  %v3694_v55 = vld [vmem:[%s5513_s1 + $0x1b4] sm:$0xf0]  ;;  %v3133_v58 = vor.u32 %v3678_v53, %v3132_v52  ;;  %v3644_v60 = vld [vmem:[%s5513_s1 + $0x24] sm:$0xf0] }
  0x21   : > { %1396 = vmatpush.bf16.msra.mxu3 %v3213_v38  ;;  %v3060_v61 = vld [vmem:[%s5513_s1 + $0xa0] sm:$0xf]  ;;  %v3197_v62 = vor.u32 %v3694_v55, %v3196_v54  ;;  %v3660_v63 = vld [vmem:[%s5513_s1 + $0xa4] sm:$0xf0]  ;;  %v2997_v4 = vor.u32 %v3644_v60, %v2996_v59  ;;  %v2988_v5 = vld [vmem:[%s5513_s1 + $0x10] sm:$0xf] }
  0x22   : > { %1250 = vmatpush.bf16.msra.mxu0 %v3013_v44  ;;  %v3124_v0 = vld [vmem:[%s5513_s1 + $0x120] sm:$0xf]  ;;  %v3676_v1 = vld [vmem:[%s5513_s1 + $0x124] sm:$0xf0]  ;;  %v3642_v6 = vld [vmem:[%s5513_s1 + $0x14] sm:$0xf0]  ;;  %v3061_v7 = vor.u32 %v3660_v63, %v3060_v61 }
  0x23   : > { %1299 = vmatpush.bf16.msra.mxu1 %v3077_v45  ;;  %v3188_v2 = vld [vmem:[%s5513_s1 + $0x1a0] sm:$0xf]  ;;  %v3692_v3 = vld [vmem:[%s5513_s1 + $0x1a4] sm:$0xf0]  ;;  %v3125_v8 = vor.u32 %v3676_v1, %v3124_v0  ;;  %v3052_v9 = vld [vmem:[%s5513_s1 + $0x90] sm:$0xf]  ;;  %v2989_v17 = vor.u32 %v3642_v6, %v2988_v5 }
  0x24   : > { %1348 = vmatpush.bf16.msra.mxu2 %v3141_v46  ;;  %v3658_v10 = vld [vmem:[%s5513_s1 + $0x94] sm:$0xf0]  ;;  %v3116_v11 = vld [vmem:[%s5513_s1 + $0x110] sm:$0xf]  ;;  %v3189_v12 = vor.u32 %v3692_v3, %v3188_v2  ;;  %s2752_s8 = sshll.u32 %s3957_s28, 4  ;;  %vm1222_vm0 = vcmask 130048  }
  0x25   : > { %1397 = vmatpush.bf16.msra.mxu3 %v3205_v50  ;;  %v3674_v13 = vld [vmem:[%s5513_s1 + $0x114] sm:$0xf0]  ;;  %v3180_v14 = vld [vmem:[%s5513_s1 + $0x190] sm:$0xf]  ;;  %v2980_v16 = vld [vmem:[%s5513_s1] sm:$0xf]  ;;  %v3053_v21 = vor.u32 %v3658_v10, %v3052_v9 }
  0x26   : > { %1251 = vmatpush.bf16.msra.mxu0 %v3005_v56  ;;  %v3690_v15 = vld [vmem:[%s5513_s1 + $0x194] sm:$0xf0]  ;;  %p276_p10 = scmp.lt.s32.totalorder %s2752_s8, 31  ;;  %v3640_v18 = vld [vmem:[%s5513_s1 + $0x4] sm:$0xf0]  ;;  %v3117_v22 = vor.u32 %v3674_v13, %v3116_v11  ;;  %s272_s20 = sand.u32 1, %s3884_s25  }
  0x27   : > { %1300 = vmatpush.bf16.msra.mxu1 %v3069_v57  ;;  %v3044_v19 = vld [vmem:[%s5513_s1 + $0x80] sm:$0xf]  ;;  %v3656_v20 = vld [vmem:[%s5513_s1 + $0x84] sm:$0xf0]  ;;  %v3181_v25 = vor.u32 %v3690_v15, %v3180_v14  ;;  %v3292_v28 = vld [vmem:[%s5513_s1 + $0x270] sm:$0xf]  ;;  %v2981_v30 = vor.u32 %v3640_v18, %v2980_v16 }
  0x28   : > { %1349 = vmatpush.bf16.msra.mxu2 %v3133_v58  ;;  %v3108_v23 = vld [vmem:[%s5513_s1 + $0x100] sm:$0xf]  ;;  %v3672_v24 = vld [vmem:[%s5513_s1 + $0x104] sm:$0xf0]  ;;  %s5581_s8 = smov (!%p276_p10, %s2752_s8), 31  ;;  %v3045_v33 = vor.u32 %v3656_v20, %v3044_v19  ;;  %s2751_s23 = sshll.u32 %s272_s20, 7 }
  0x29   : > { %1398 = vmatpush.bf16.msra.mxu3 %v3197_v62  ;;  %v3172_v26 = vld [vmem:[%s5513_s1 + $0x180] sm:$0xf]  ;;  %v3688_v27 = vld [vmem:[%s5513_s1 + $0x184] sm:$0xf0]  ;;  %s3786_s17 = smul.u32 28, %s5581_s8  ;;  %v3109_v34 = vor.u32 %v3672_v24, %v3108_v23  ;;  %s3785_s29 = sshll.u32 %s3957_s28, 7 }
  0x2a   : > { %1252 = vmatpush.bf16.msra.mxu0 %v2997_v4  ;;  %v3718_v29 = vld [vmem:[%s5513_s1 + $0x274] sm:$0xf0]  ;;  %v3356_v31 = vld [vmem:[%s5513_s1 + $0x2f0] sm:$0xf]  ;;  %v3284_v35 = vld [vmem:[%s5513_s1 + $0x260] sm:$0xf]  ;;  %v3173_v37 = vor.u32 %v3688_v27, %v3172_v26  ;;  %s2681_s13 = scalar_lea.hbm %s5519_s7, %s3785_s29 }
  0x2b   : > { %1301 = vmatpush.bf16.msra.mxu1 %v3061_v7  ;;  %v3734_v32 = vld [vmem:[%s5513_s1 + $0x2f4] sm:$0xf0]  ;;  %s4192_s14 = scalar_lea.vmem %s5512_s0, %s3786_s17  ;;  %v3716_v36 = vld [vmem:[%s5513_s1 + $0x264] sm:$0xf0]  ;;  %v3293_v41 = vor.u32 %v3718_v29, %v3292_v28  ;;  %v3348_v42 = vld [vmem:[%s5513_s1 + $0x2e0] sm:$0xf] }
  0x2c   : > { %1350 = vmatpush.bf16.msra.mxu2 %v3125_v8  ;;  %v2756_v38 = vld [vmem:[%s4192_s14] sm:$0xf]  ;;  %v3586_v39 = vld [vmem:[%s4192_s14 + $0x18] sm:$0xf0]  ;;  %v3583_v40 = vld [vmem:[%s4192_s14 + $0x4] sm:$0xf]  ;;  %v3357_v47 = vor.u32 %v3734_v32, %v3356_v31  ;;  %v3285_v54 = vor.u32 %v3716_v36, %v3284_v35 }
  0x2d   : > { %1399 = vmatpush.bf16.msra.mxu3 %v3189_v12  ;;  %v4206_v43 = vor.u32 %v3586_v39, %v2756_v38  ;;  %v2758_v44 = vld [vmem:[%s4192_s14 + $0x1c] sm:$0xf0]  ;;  %v2764_v45 = vld [vmem:[%s4192_s14 + $0x8] sm:$0xf]  ;;  %v3587_v46 = vld [vmem:[%s4192_s14 + $0x20] sm:$0xf0] }
  0x2e   : > { %1253 = vmatpush.bf16.msra.mxu0 %v2989_v17  ;;  %v4211_v48 = vor.u32 %v3583_v40, %v2758_v44  ;;  %v4213_v49 = vor.u32 %v3587_v46, %v2764_v45  ;;  %v3584_v50 = vld [vmem:[%s4192_s14 + $0xc] sm:$0xf]  ;;  %v2766_v51 = vld [vmem:[%s4192_s14 + $0x24] sm:$0xf0]  ;;  %v3276_v56 = vld [vmem:[%s5513_s1 + $0x250] sm:$0xf] }
  0x2f   : > { %1302 = vmatpush.bf16.msra.mxu1 %v3053_v21  ;;  %v3732_v52 = vld [vmem:[%s5513_s1 + $0x2e4] sm:$0xf0]  ;;  %v4220_v53 = vor.u32 %v3584_v50, %v2766_v51  ;;  %v3714_v57 = vld [vmem:[%s5513_s1 + $0x254] sm:$0xf0]  ;;  %v3340_v59 = vld [vmem:[%s5513_s1 + $0x2d0] sm:$0xf] }
  0x30   : > { %1351 = vmatpush.bf16.msra.mxu2 %v3117_v22  ;;  %v3349_v55 = vor.u32 %v3732_v52, %v3348_v42  ;;  %v3277_v58 = vor.u32 %v3714_v57, %v3276_v56  ;;  %v3730_v60 = vld [vmem:[%s5513_s1 + $0x2d4] sm:$0xf0]  ;;  %v3593_v63 = vld [vmem:[%s4192_s14 + $0x50] sm:$0xf0]  ;;  %v3590_v0 = vld [vmem:[%s4192_s14 + $0x3c] sm:$0xf] }
  0x31   : > { %1400 = vmatpush.bf16.msra.mxu3 %v3181_v25  ;;  %v3341_v61 = vor.u32 %v3730_v60, %v3340_v59  ;;  %v2784_v62 = vld [vmem:[%s4192_s14 + $0x38] sm:$0xf]  ;;  %v2792_v2 = vld [vmem:[%s4192_s14 + $0x40] sm:$0xf]  ;;  %v3594_v3 = vld [vmem:[%s4192_s14 + $0x58] sm:$0xf0] }
  0x32   : > { %1254 = vmatpush.bf16.msra.mxu0 %v2981_v30  ;;  %v2786_v1 = vld [vmem:[%s4192_s14 + $0x54] sm:$0xf0]  ;;  %v3591_v4 = vld [vmem:[%s4192_s14 + $0x44] sm:$0xf]  ;;  %v2794_v5 = vld [vmem:[%s4192_s14 + $0x5c] sm:$0xf0]  ;;  %v4246_v6 = vor.u32 %v3593_v63, %v2784_v62  ;;  %v4250_v8 = vor.u32 %v3594_v3, %v2792_v2 }
  0x33   : > { %1303 = vmatpush.bf16.msra.mxu1 %v3045_v33  ;;  %v4248_v7 = vor.u32 %v3590_v0, %v2786_v1  ;;  %v4252_v9 = vor.u32 %v3591_v4, %v2794_v5  ;;  %v3268_v10 = vld [vmem:[%s5513_s1 + $0x240] sm:$0xf]  ;;  %v3712_v11 = vld [vmem:[%s5513_s1 + $0x244] sm:$0xf0]  ;;  %v2812_v16 = vld [vmem:[%s4192_s14 + $0x70] sm:$0xf] }
  0x34   : > { %1352 = vmatpush.bf16.msra.mxu2 %v3109_v34  ;;  %v3269_v12 = vor.u32 %v3712_v11, %v3268_v10  ;;  %v3332_v13 = vld [vmem:[%s5513_s1 + $0x2c0] sm:$0xf]  ;;  %v3728_v14 = vld [vmem:[%s5513_s1 + $0x2c4] sm:$0xf0]  ;;  %v3600_v17 = vld [vmem:[%s4192_s14 + $0x88] sm:$0xf0] }
  0x35   : > { %1401 = vmatpush.bf16.msra.mxu3 %v3173_v37  ;;  %1255 = vmatmul.bf16.vlgmr.msra.gmra.mxu0 %v4206_v43  ;;  %v3333_v15 = vor.u32 %v3728_v14, %v3332_v13  ;;  %v3597_v18 = vld [vmem:[%s4192_s14 + $0x74] sm:$0xf]  ;;  %v2814_v19 = vld [vmem:[%s4192_s14 + $0x8c] sm:$0xf0]  ;;  %v2820_v20 = vld [vmem:[%s4192_s14 + $0x78] sm:$0xf]  ;;  %v4278_v24 = vor.u32 %v3600_v17, %v2812_v16 }
  0x36   : > { %1443 = vmatpush.bf16.msrb.mxu0 %v3293_v41  ;;  %1304 = vmatmul.bf16.vlgmr.msra.gmra.mxu1 %v4211_v48  ;;  %v3601_v21 = vld [vmem:[%s4192_s14 + $0x90] sm:$0xf0]  ;;  %v3598_v22 = vld [vmem:[%s4192_s14 + $0x7c] sm:$0xf]  ;;  %v2822_v23 = vld [vmem:[%s4192_s14 + $0x94] sm:$0xf0]  ;;  %v4280_v25 = vor.u32 %v3597_v18, %v2814_v19 }
  0x37   : > { %1492 = vmatpush.bf16.msrb.mxu1 %v3357_v47  ;;  %1353 = vmatmul.bf16.vlgmr.msra.gmra.mxu2 %v4213_v49  ;;  %v4282_v26 = vor.u32 %v3601_v21, %v2820_v20  ;;  %v4284_v27 = vor.u32 %v3598_v22, %v2822_v23  ;;  %v3260_v28 = vld [vmem:[%s5513_s1 + $0x230] sm:$0xf]  ;;  %v3710_v29 = vld [vmem:[%s5513_s1 + $0x234] sm:$0xf0]  ;;  %v2840_v34 = vld [vmem:[%s4192_s14 + $0xa8] sm:$0xf] }
  0x38   : > { %1402 = vmatmul.bf16.vlgmr.msra.gmra.mxu3 %v4220_v53  ;;  %v3261_v30 = vor.u32 %v3710_v29, %v3260_v28  ;;  %v3324_v31 = vld [vmem:[%s5513_s1 + $0x2b0] sm:$0xf]  ;;  %v3726_v32 = vld [vmem:[%s5513_s1 + $0x2b4] sm:$0xf0]  ;;  %v3607_v35 = vld [vmem:[%s4192_s14 + $0xc0] sm:$0xf0] }
  0x39   : > { %v3325_v33 = vor.u32 %v3726_v32, %v3324_v31  ;;  %v3604_v36 = vld [vmem:[%s4192_s14 + $0xac] sm:$0xf]  ;;  %v2842_v37 = vld [vmem:[%s4192_s14 + $0xc4] sm:$0xf0]  ;;  %v2848_v38 = vld [vmem:[%s4192_s14 + $0xb0] sm:$0xf]  ;;  %v4310_v42 = vor.u32 %v3607_v35, %v2840_v34 }
  0x3a   : > { %1444 = vmatpush.bf16.msrb.mxu0 %v3285_v54  ;;  %v3608_v39 = vld [vmem:[%s4192_s14 + $0xc8] sm:$0xf0]  ;;  %v3605_v40 = vld [vmem:[%s4192_s14 + $0xb4] sm:$0xf]  ;;  %v2850_v41 = vld [vmem:[%s4192_s14 + $0xcc] sm:$0xf0]  ;;  %v4312_v44 = vor.u32 %v3604_v36, %v2842_v37 }
  0x3b   : > { %1493 = vmatpush.bf16.msrb.mxu1 %v3349_v55  ;;  %v4314_v45 = vor.u32 %v3608_v39, %v2848_v38  ;;  %v4316_v46 = vor.u32 %v3605_v40, %v2850_v41  ;;  %v3252_v47 = vld [vmem:[%s5513_s1 + $0x220] sm:$0xf]  ;;  %v3708_v50 = vld [vmem:[%s5513_s1 + $0x224] sm:$0xf0]  ;;  %v3614_v57 = vld [vmem:[%s4192_s14 + $0xf8] sm:$0xf0] }
  0x3c   : > { %v3253_v51 = vor.u32 %v3708_v50, %v3252_v47  ;;  %v3316_v52 = vld [vmem:[%s5513_s1 + $0x2a0] sm:$0xf]  ;;  %v3724_v54 = vld [vmem:[%s5513_s1 + $0x2a4] sm:$0xf0]  ;;  %v3612_v62 = vld [vmem:[%s4192_s14 + $0xec] sm:$0xf] }
  0x3d   : > { %v3317_v55 = vor.u32 %v3724_v54, %v3316_v52  ;;  %v2868_v56 = vld [vmem:[%s4192_s14 + $0xe0] sm:$0xf]  ;;  %v2876_v60 = vld [vmem:[%s4192_s14 + $0xe8] sm:$0xf]  ;;  %v3244_v4 = vld [vmem:[%s5513_s1 + $0x210] sm:$0xf] }
  0x3e   : > { %1445 = vmatpush.bf16.msrb.mxu0 %v3277_v58  ;;  %v3611_v58 = vld [vmem:[%s4192_s14 + $0xe4] sm:$0xf]  ;;  %v2870_v59 = vld [vmem:[%s4192_s14 + $0xfc] sm:$0xf0]  ;;  %v2878_v63 = vld [vmem:[%s4192_s14 + $0x104] sm:$0xf0]  ;;  %v4342_v0 = vor.u32 %v3614_v57, %v2868_v56 }
  0x3f   : > { %1494 = vmatpush.bf16.msrb.mxu1 %v3341_v61  ;;  %v3615_v61 = vld [vmem:[%s4192_s14 + $0x100] sm:$0xf0]  ;;  %v4344_v1 = vor.u32 %v3611_v58, %v2870_v59  ;;  %v4348_v3 = vor.u32 %v3612_v62, %v2878_v63  ;;  %v3706_v5 = vld [vmem:[%s5513_s1 + $0x214] sm:$0xf0]  ;;  %v3653_v10 = vld [vmem:[%s5513_s1 + $0x74] sm:$0xf] }
  0x40   : > { %v4346_v2 = vor.u32 %v3615_v61, %v2876_v60  ;;  %v3245_v11 = vor.u32 %v3706_v5, %v3244_v4  ;;  %v3722_v13 = vld [vmem:[%s5513_s1 + $0x294] sm:$0xf0]  ;;  %v3038_v14 = vld [vmem:[%s5513_s1 + $0x78] sm:$0xf0]  ;;  %v3651_v17 = vld [vmem:[%s5513_s1 + $0x64] sm:$0xf] }
  0x41   : > { %v3041_v16 = vor.u32 %v3653_v10, %v3038_v14  ;;  %v3030_v18 = vld [vmem:[%s5513_s1 + $0x68] sm:$0xf0]  ;;  %v3649_v20 = vld [vmem:[%s5513_s1 + $0x54] sm:$0xf]  ;;  %v3022_v21 = vld [vmem:[%s5513_s1 + $0x58] sm:$0xf0] }
  0x42   : > { %1446 = vmatpush.bf16.msrb.mxu0 %v3269_v12  ;;  %v3308_v12 = vld [vmem:[%s5513_s1 + $0x290] sm:$0xf]  ;;  %v3033_v19 = vor.u32 %v3651_v17, %v3030_v18  ;;  %v2896_v22 = vld [vmem:[%s4192_s14 + $0x118] sm:$0xf]  ;;  %v3621_v23 = vld [vmem:[%s4192_s14 + $0x130] sm:$0xf0]  ;;  %v3025_v29 = vor.u32 %v3649_v20, %v3022_v21 }
  0x43   : > { %1495 = vmatpush.bf16.msrb.mxu1 %v3333_v15  ;;  %v3309_v15 = vor.u32 %v3722_v13, %v3308_v12  ;;  %1590 = vmatpush.bf16.msrb.mxu3 %v3041_v16  ;;  %v3618_v28 = vld [vmem:[%s4192_s14 + $0x11c] sm:$0xf]  ;;  %v2904_v31 = vld [vmem:[%s4192_s14 + $0x120] sm:$0xf]  ;;  %v4392_v35 = vor.u32 %v3621_v23, %v2896_v22  ;;  %v3647_v36 = vld [vmem:[%s5513_s1 + $0x44] sm:$0xf] }
  0x44   : > { %v3622_v32 = vld [vmem:[%s4192_s14 + $0x138] sm:$0xf0]  ;;  %v2906_v34 = vld [vmem:[%s4192_s14 + $0x13c] sm:$0xf0]  ;;  %v3014_v37 = vld [vmem:[%s5513_s1 + $0x48] sm:$0xf0] }
  0x45   : > { %1260 = vmatmul.bf16.gmra.mxu0 %v4246_v6  ;;  %v4402_v39 = vor.u32 %v3622_v32, %v2904_v31  ;;  %v3017_v41 = vor.u32 %v3647_v36, %v3014_v37  ;;  %v3236_v47 = vld [vmem:[%s5513_s1 + $0x200] sm:$0xf]  ;;  %v3704_v50 = vld [vmem:[%s5513_s1 + $0x204] sm:$0xf0]  ;;  %v3006_v56 = vld [vmem:[%s5513_s1 + $0x38] sm:$0xf0] }
  0x46   : > { %1309 = vmatmul.bf16.gmra.mxu1 %v4248_v7  ;;  %1447 = vmatpush.bf16.msrb.mxu0 %v3261_v30  ;;  %v2898_v30 = vld [vmem:[%s4192_s14 + $0x134] sm:$0xf0]  ;;  %v3237_v52 = vor.u32 %v3704_v50, %v3236_v47  ;;  %v3300_v54 = vld [vmem:[%s5513_s1 + $0x280] sm:$0xf]  ;;  %v3736_v60 = vld [vmem:[%s5513_s1 + $0x304] sm:$0xf0] }
  0x47   : > { %1358 = vmatmul.bf16.gmra.mxu2 %v4250_v8  ;;  %1496 = vmatpush.bf16.msrb.mxu1 %v3325_v33  ;;  %v3619_v33 = vld [vmem:[%s4192_s14 + $0x124] sm:$0xf]  ;;  %v4400_v38 = vor.u32 %v3618_v28, %v2898_v30  ;;  %v3364_v59 = vld [vmem:[%s5513_s1 + $0x300] sm:$0xf]  ;;  %v2998_v63 = vld [vmem:[%s5513_s1 + $0x28] sm:$0xf0] }
  0x48   : > { %1407 = vmatmul.bf16.gmra.mxu3 %v4252_v9  ;;  %v4404_v40 = vor.u32 %v3619_v33, %v2906_v34  ;;  %v3365_v61 = vor.u32 %v3736_v60, %v3364_v59  ;;  %v3643_v62 = vld [vmem:[%s5513_s1 + $0x24] sm:$0xf]  ;;  %v3641_v5 = vld [vmem:[%s5513_s1 + $0x14] sm:$0xf]  ;;  %v2990_v10 = vld [vmem:[%s5513_s1 + $0x18] sm:$0xf0] }
  0x49   : > { %1591 = vmatpush.bf16.msrb.mxu3 %v3033_v19  ;;  %v3001_v4 = vor.u32 %v3643_v62, %v2998_v63  ;;  %v3628_v12 = vld [vmem:[%s4192_s14 + $0x168] sm:$0xf0]  ;;  %v3625_v13 = vld [vmem:[%s4192_s14 + $0x154] sm:$0xf]  ;;  %v2926_v14 = vld [vmem:[%s4192_s14 + $0x16c] sm:$0xf0]  ;;  %v2993_v19 = vor.u32 %v3641_v5, %v2990_v10 }
  0x4a   : > { %1448 = vmatpush.bf16.msrb.mxu0 %v3253_v51  ;;  %v3645_v51 = vld [vmem:[%s5513_s1 + $0x34] sm:$0xf]  ;;  %1548 = vmatpush.bf16.msrb.mxu2 %v3365_v61  ;;  %v3626_v17 = vld [vmem:[%s4192_s14 + $0x15c] sm:$0xf]  ;;  %v2934_v18 = vld [vmem:[%s4192_s14 + $0x174] sm:$0xf0]  ;;  %v4456_v21 = vor.u32 %v3625_v13, %v2926_v14 }
  0x4b   : > { %1497 = vmatpush.bf16.msrb.mxu1 %v3317_v55  ;;  %v3720_v55 = vld [vmem:[%s5513_s1 + $0x284] sm:$0xf0]  ;;  %v3009_v58 = vor.u32 %v3645_v51, %v3006_v56  ;;  %v3629_v16 = vld [vmem:[%s4192_s14 + $0x170] sm:$0xf0]  ;;  %v3639_v23 = vld [vmem:[%s5513_s1 + $0x4] sm:$0xf] }
  0x4c   : > { %v3301_v57 = vor.u32 %v3720_v55, %v3300_v54  ;;  %v2982_v28 = vld [vmem:[%s5513_s1 + $0x8] sm:$0xf0]  ;;  %v3669_v31 = vld [vmem:[%s5513_s1 + $0xf4] sm:$0xf]  ;;  %v3102_v32 = vld [vmem:[%s5513_s1 + $0xf8] sm:$0xf0] }
  0x4d   : > { %1592 = vmatpush.bf16.msrb.mxu3 %v3025_v29  ;;  %v4466_v29 = vor.u32 %v3626_v17, %v2934_v18  ;;  %v2985_v30 = vor.u32 %v3639_v23, %v2982_v28  ;;  %v3105_v33 = vor.u32 %v3669_v31, %v3102_v32  ;;  %v3685_v34 = vld [vmem:[%s5513_s1 + $0x174] sm:$0xf]  ;;  %v3166_v36 = vld [vmem:[%s5513_s1 + $0x178] sm:$0xf0]  ;;  %v3635_v47 = vld [vmem:[%s4192_s14 + $0x1a0] sm:$0xf0] }
  0x4e   : > { %1449 = vmatpush.bf16.msrb.mxu0 %v3245_v11  ;;  %v2924_v11 = vld [vmem:[%s4192_s14 + $0x150] sm:$0xf]  ;;  %v3169_v37 = vor.u32 %v3685_v34, %v3166_v36  ;;  %v3632_v50 = vld [vmem:[%s4192_s14 + $0x18c] sm:$0xf]  ;;  %v2954_v51 = vld [vmem:[%s4192_s14 + $0x1a4] sm:$0xf0] }
  0x4f   : > { %1498 = vmatpush.bf16.msrb.mxu1 %v3309_v15  ;;  %v2932_v15 = vld [vmem:[%s4192_s14 + $0x158] sm:$0xf]  ;;  %v4454_v20 = vor.u32 %v3628_v12, %v2924_v11  ;;  %v3636_v54 = vld [vmem:[%s4192_s14 + $0x1a8] sm:$0xf0]  ;;  %v3633_v55 = vld [vmem:[%s4192_s14 + $0x194] sm:$0xf] }
  0x50   : > { %v4458_v22 = vor.u32 %v3629_v16, %v2932_v15  ;;  %v2962_v56 = vld [vmem:[%s4192_s14 + $0x1ac] sm:$0xf0]  ;;  %v3667_v61 = vld [vmem:[%s5513_s1 + $0xe4] sm:$0xf]  ;;  %v3094_v62 = vld [vmem:[%s5513_s1 + $0xe8] sm:$0xf0] }
  0x51   : > { %1593 = vmatpush.bf16.msrb.mxu3 %v3017_v41  ;;  %v2952_v41 = vld [vmem:[%s4192_s14 + $0x188] sm:$0xf]  ;;  %v4498_v60 = vor.u32 %v3633_v55, %v2962_v56  ;;  %v3097_v63 = vor.u32 %v3667_v61, %v3094_v62  ;;  %v3158_v5 = vld [vmem:[%s5513_s1 + $0x168] sm:$0xf0]  ;;  %v446_v11 = vld [vmem:[%s5514_s2] sm:$0x3] }
  0x52   : > { %1450 = vmatpush.bf16.msrb.mxu0 %v3237_v52  ;;  %v2960_v52 = vld [vmem:[%s4192_s14 + $0x190] sm:$0xf]  ;;  %v4519_v12 = vperm.slane %v446_v11, 0  ;;  %v3588_v14 = vld [vmem:[%s4192_s14 + $0x28] sm:$0xf0]  ;;  %s2684_s16 = sshll.u32 %s2681_s13, 4  ;;  %s2685_s16 = int_to_ptr.hbm [resolvable:$true] %s2684_s16 }
  0x53   : > { %1499 = vmatpush.bf16.msrb.mxu1 %v3301_v57  ;;  %v4492_v57 = vor.u32 %v3635_v47, %v2952_v41  ;;  %v4496_v59 = vor.u32 %v3636_v54, %v2960_v52  ;;  %5540 = vst [vmem:[#allocation5_spill] sm:$0xff] %v4498_v60  ;;  %v2772_v13 = vld [vmem:[%s4192_s14 + $0x10] sm:$0xf]  ;;  %v3585_v15 = vld [vmem:[%s4192_s14 + $0x14] sm:$0xf]  ;;  %s2670_s18 = scalar_lea.sflag [#allocation3], %s272_s20 }
  0x54   : > { %v2774_v16 = vld [vmem:[%s4192_s14 + $0x2c] sm:$0xf0]  ;;  %v2780_v17 = vld [vmem:[%s4192_s14 + $0x18] sm:$0xf]  ;;  %v3589_v18 = vld [vmem:[%s4192_s14 + $0x30] sm:$0xf0] }
  0x55   : > { %1265 = vmatmul.bf16.gmra.mxu0 %v4278_v24  ;;  %1594 = vmatpush.bf16.msrb.mxu3 %v3009_v58  ;;  %v4494_v58 = vor.u32 %v3632_v50, %v2954_v51  ;;  %v4529_v28 = vor.u32 %v3585_v15, %v2774_v16  ;;  %v3665_v34 = vld [vmem:[%s5513_s1 + $0xd4] sm:$0xf]  ;;  %v3086_v36 = vld [vmem:[%s5513_s1 + $0xd8] sm:$0xf0]  ;;  %v2808_v11 = vld [vmem:[%s4192_s14 + $0x50] sm:$0xf] }
  0x56   : > { %1314 = vmatmul.bf16.gmra.mxu1 %v4280_v25  ;;  %1639 = vmatpush.bf16.msra.mxu0 %v3105_v33  ;;  %v3681_v41 = vld [vmem:[%s5513_s1 + $0x154] sm:$0xf]  ;;  %v3150_v47 = vld [vmem:[%s5513_s1 + $0x158] sm:$0xf0]  ;;  %s3844_s28 = sshra.s32 %s2685_s16, 4  ;;  %s3850_s22 = scalar_lea.hbm %s5519_s7, 256  ;;  %s3845_s28 = int_to_ptr.hbm [resolvable:$true] %s3844_s28 }
  0x57   : > { %1363 = vmatmul.bf16.gmra.mxu2 %v4282_v26  ;;  %1688 = vmatpush.bf16.msra.mxu1 %v3169_v37  ;;  %5541 = vst [vmem:[#allocation6_spill] sm:$0xff] %v4529_v28  ;;  %v3089_v37 = vor.u32 %v3665_v34, %v3086_v36  ;;  %v3153_v50 = vor.u32 %v3681_v41, %v3150_v47  ;;  %v3078_v41 = vld [vmem:[%s5513_s1 + $0xc8] sm:$0xf0]  ;;  %s3846_s19 = scalar_lea.hbm %s3845_s28, 128  ;;  %p3851_p0 = scmp.lt.s32.totalorder %s3845_s28, %s5519_s7 }
  0x58   : > { %1412 = vmatmul.bf16.gmra.mxu3 %v4284_v27  ;;  %p3847_p11 = scmp.ne.s32.totalorder %s3845_s28, %s3846_s19  ;;  %p3852_p1 = scmp.lt.s32.totalorder %s3850_s22, %s3846_s19 }
  0x59   : > { %1595 = vmatpush.bf16.msrb.mxu3 %v3001_v4  ;;  %v3683_v4 = vld [vmem:[%s5513_s1 + $0x164] sm:$0xf] }
  0x5a   : > { %v3161_v10 = vor.u32 %v3683_v4, %v3158_v5  ;;  %1640 = vmatpush.bf16.msra.mxu0 %v3097_v63  ;;  %v2800_v63 = vld [vmem:[%s4192_s14 + $0x48] sm:$0xf]  ;;  %v3595_v4 = vld [vmem:[%s4192_s14 + $0x60] sm:$0xf0]  ;;  %v3592_v5 = vld [vmem:[%s4192_s14 + $0x4c] sm:$0xf]  ;;  %p3848_p12 = pnand %p3847_p11, %p3974_p5  ;;  %p3853_p2 = por %p3852_p1, %p3851_p0 }
  0x5b   : > { %v4560_v15 = vor.u32 %v3595_v4, %v2800_v63 }
  0x5c   : > { %1689 = vmatpush.bf16.msra.mxu1 %v3161_v10  ;;  %v2802_v10 = vld [vmem:[%s4192_s14 + $0x64] sm:$0xf0]  ;;  %p3849_p13 = pneg %p3848_p12 }
  0x5d   : > { %1596 = vmatpush.bf16.msrb.mxu3 %v2993_v19  ;;  %v4527_v19 = vor.u32 %v3588_v14, %v2772_v13  ;;  %v3596_v13 = vld [vmem:[%s4192_s14 + $0x68] sm:$0xf0] }
  0x5e   : > { %1641 = vmatpush.bf16.msra.mxu0 %v3089_v37  ;;  %v3663_v37 = vld [vmem:[%s5513_s1 + $0xc4] sm:$0xf]  ;;  %p3854_p3 = pnand %p3853_p2, %p3849_p13 }
  0x5f   : > { %v3081_v47 = vor.u32 %v3663_v37, %v3078_v41 }
  0x60   : > { %1690 = vmatpush.bf16.msra.mxu1 %v3153_v50  ;;  %v3679_v50 = vld [vmem:[%s5513_s1 + $0x144] sm:$0xf] }
  0x61   : > { %1597 = vmatpush.bf16.msrb.mxu3 %v2985_v30  ;;  %v4531_v30 = vor.u32 %v3589_v18, %v2780_v17 }
  0x62   : > { %1642 = vmatpush.bf16.msra.mxu0 %v3081_v47 }
  0x63   : > { %5542 = vst [vmem:[#allocation7_spill] sm:$0xff] %v4531_v30 }
  0x65   : > { %1270 = vmatmul.bf16.gmra.mxu0 %v4310_v42 }
  0x66   : > { %1319 = vmatmul.bf16.gmra.mxu1 %v4312_v44 }
  0x67   : > { %1368 = vmatmul.bf16.gmra.mxu2 %v4314_v45 }
  0x68   : > { %1417 = vmatmul.bf16.gmra.mxu3 %v4316_v46 }
  0x75   : > { %1275 = vmatmul.bf16.gmra.mxu0 %v4342_v0 }
  0x76   : > { %1324 = vmatmul.bf16.gmra.mxu1 %v4344_v1 }
  0x77   : > { %1373 = vmatmul.bf16.gmra.mxu2 %v4346_v2 }
  0x78   : > { %1422 = vmatmul.bf16.gmra.mxu3 %v4348_v3 }
  0x85   : > { %1280 = vmatmul.bf16.gmra.mxu0 %v4392_v35 }
  0x86   : > { %1329 = vmatmul.bf16.gmra.mxu1 %v4400_v38 }
  0x87   : > { %1378 = vmatmul.bf16.gmra.mxu2 %v4402_v39 }
  0x88   : > { %1427 = vmatmul.bf16.gmra.mxu3 %v4404_v40 }
  0x95   : > { %1285 = vmatmul.bf16.gmra.mxu0 %v4454_v20 }
  0x96   : > { %1334 = vmatmul.bf16.gmra.mxu1 %v4456_v21 }
  0x97   : > { %1383 = vmatmul.bf16.gmra.mxu2 %v4458_v22 }
  0x98   : > { %1432 = vmatmul.bf16.gmra.mxu3 %v4466_v29 }
  0xa5   : > { %1290 = vmatmul.bf16.gmra.mxu0 %v4492_v57 }
  0xa6   : > { %1339 = vmatmul.bf16.gmra.mxu1 %v4494_v58 }
  0xa7   : > { %1388 = vmatmul.bf16.gmra.mxu2 %v4496_v59 }
  0xa8   : > { %1437 = vmatmul.bf16.gmra.mxu3 %v4498_v60 }
  0xb2   : > { %v1256_v23 = vpop.f32.mrf.mxu0 }
  0xb3   : > { %v1257_v31 = vadd.f32 %v1256_v23, %v4519_v12  ;;  %v1305_v32 = vpop.f32.mrf.mxu1  ;;  %v4562_v23 = vor.u32 %v3592_v5, %v2802_v10  ;;  %v2828_v5 = vld [vmem:[%s4192_s14 + $0x80] sm:$0xf]  ;;  %v3602_v10 = vld [vmem:[%s4192_s14 + $0x98] sm:$0xf0] }
  0xb5   : > { %v1306_v33 = vadd.f32 %v1305_v32, %v1257_v31  ;;  %1451 = vmatmul.bf16.vlgmr.msrb.gmra.mxu0 %v4527_v19  ;;  %5543 = vst [vmem:[#allocation8_spill] sm:$0xff] %v4562_v23  ;;  %v4564_v31 = vor.u32 %v3596_v13, %v2808_v11  ;;  %v3599_v11 = vld [vmem:[%s4192_s14 + $0x84] sm:$0xf]  ;;  %v2830_v13 = vld [vmem:[%s4192_s14 + $0x9c] sm:$0xf0] }
  0xb6   : > { %1500 = vmatmul.bf16.vlgmr.msrb.gmra.mxu1 %v4529_v28  ;;  %v4597_v37 = vor.u32 %v3599_v11, %v2830_v13 }
  0xb7   : > { %3370 = vmatmul.msk.bf16.vlgmr.msrb.gmra.mxu2 %vm1222_vm0, %v4531_v30  ;;  %5544 = vst [vmem:[#allocation9_spill] sm:$0xff] %v4564_v31 }
  0xb8   : > { %1598 = vmatmul.bf16.vlgmr.msrb.gmra.mxu3 %v4206_v43  ;;  %5545 = vst [vmem:[#allocation10_spill] sm:$0xff] %v4597_v37 }
  0xba   : > { %v1354_v51 = vpop.f32.mrf.mxu2  ;;  %v1258_v54 = vpop.f32.mrf.mxu0 }
  0xbb   : > { %v1355_v52 = vadd.f32 %v1354_v51, %v1306_v33  ;;  %v1403_v43 = vpop.f32.mrf.mxu3  ;;  %v1259_v55 = vadd.f32 %v1258_v54, %v4519_v12  ;;  %v1307_v56 = vpop.f32.mrf.mxu1  ;;  %v3142_v51 = vld [vmem:[%s5513_s1 + $0x148] sm:$0xf0] }
  0xbd   : > { %v4552_v61 = vadd.f32 %v1403_v43, %v1355_v52  ;;  %v1308_v62 = vadd.f32 %v1307_v56, %v1259_v55  ;;  %v3145_v52 = vor.u32 %v3679_v50, %v3142_v51 }
  0xbf   : > { %1691 = vmatpush.bf16.msra.mxu1 %v3145_v52 }
  0xc2   : > { %v1356_v14 = vpop.f32.mrf.mxu2  ;;  %v1261_v17 = vpop.f32.mrf.mxu0 }
  0xc3   : > { %v1357_v16 = vadd.f32 %v1356_v14, %v1308_v62  ;;  %v1405_v18 = vpop.f32.mrf.mxu3  ;;  %v1262_v32 = vadd.f32 %v1261_v17, %v4519_v12  ;;  %v1310_v33 = vpop.f32.mrf.mxu1  ;;  %v2836_v14 = vld [vmem:[%s4192_s14 + $0x88] sm:$0xf] }
  0xc5   : > { %v4567_v34 = vadd.f32 %v1405_v18, %v1357_v16  ;;  %v1311_v36 = vadd.f32 %v1310_v33, %v1262_v32  ;;  %1456 = vmatmul.bf16.gmra.mxu0 %v4560_v15  ;;  %v3603_v16 = vld [vmem:[%s4192_s14 + $0xa0] sm:$0xf0]  ;;  %v4595_v18 = vor.u32 %v3602_v10, %v2828_v5 }
  0xc6   : > { %1505 = vmatmul.bf16.gmra.mxu1 %v4562_v23  ;;  %v4599_v41 = vor.u32 %v3603_v16, %v2836_v14 }
  0xc7   : > { %3371 = vmatmul.msk.bf16.gmra.mxu2 %vm1222_vm0, %v4564_v31 }
  0xc8   : > { %1603 = vmatmul.bf16.gmra.mxu3 %v4246_v6  ;;  %5546 = vst [vmem:[#allocation11_spill] sm:$0xff] %v4599_v41 }
  0xca   : > { %v1359_v54 = vpop.f32.mrf.mxu2  ;;  %v1263_v55 = vpop.f32.mrf.mxu0 }
  0xcb   : > { %v1360_v43 = vadd.f32 %v1359_v54, %v1311_v36  ;;  %v1408_v6 = vpop.f32.mrf.mxu3  ;;  %v1264_v56 = vadd.f32 %v1263_v55, %v4519_v12  ;;  %v1312_v62 = vpop.f32.mrf.mxu1  ;;  %v3661_v54 = vld [vmem:[%s5513_s1 + $0xb4] sm:$0xf] }
  0xcd   : > { %v4587_v63 = vadd.f32 %v1408_v6, %v1360_v43  ;;  %v1313_v4 = vadd.f32 %v1312_v62, %v1264_v56  ;;  %v3070_v43 = vld [vmem:[%s5513_s1 + $0xb8] sm:$0xf0]  ;;  %v3677_v6 = vld [vmem:[%s5513_s1 + $0x134] sm:$0xf] }
  0xce   : > { %v3073_v55 = vor.u32 %v3661_v54, %v3070_v43  ;;  %v3134_v56 = vld [vmem:[%s5513_s1 + $0x138] sm:$0xf0] }
  0xcf   : > { %v3137_v62 = vor.u32 %v3677_v6, %v3134_v56 }
  0xd0   : > { %1643 = vmatpush.bf16.msra.mxu0 %v3073_v55 }
  0xd1   : > { %1692 = vmatpush.bf16.msra.mxu1 %v3137_v62 }
  0xd2   : > { %v1361_v17 = vpop.f32.mrf.mxu2  ;;  %v1266_v33 = vpop.f32.mrf.mxu0 }
  0xd3   : > { %v1362_v32 = vadd.f32 %v1361_v17, %v1313_v4  ;;  %v1410_v36 = vpop.f32.mrf.mxu3  ;;  %v1267_v47 = vadd.f32 %v1266_v33, %v4519_v12  ;;  %v1315_v50 = vpop.f32.mrf.mxu1  ;;  %v2856_v17 = vld [vmem:[%s4192_s14 + $0xb8] sm:$0xf]  ;;  %v3606_v33 = vld [vmem:[%s4192_s14 + $0xbc] sm:$0xf] }
  0xd5   : > { %v4602_v51 = vadd.f32 %v1410_v36, %v1362_v32  ;;  %v1316_v52 = vadd.f32 %v1315_v50, %v1267_v47  ;;  %1461 = vmatmul.bf16.gmra.mxu0 %v4595_v18  ;;  %v3609_v32 = vld [vmem:[%s4192_s14 + $0xd0] sm:$0xf0]  ;;  %v2858_v36 = vld [vmem:[%s4192_s14 + $0xd4] sm:$0xf0]  ;;  %v2864_v47 = vld [vmem:[%s4192_s14 + $0xc0] sm:$0xf] }
  0xd6   : > { %1510 = vmatmul.bf16.gmra.mxu1 %v4597_v37  ;;  %v3610_v50 = vld [vmem:[%s4192_s14 + $0xd8] sm:$0xf0]  ;;  %v4630_v43 = vor.u32 %v3609_v32, %v2856_v17  ;;  %v4632_v56 = vor.u32 %v3606_v33, %v2858_v36  ;;  %v3675_v17 = vld [vmem:[%s5513_s1 + $0x124] sm:$0xf]  ;;  %v3126_v32 = vld [vmem:[%s5513_s1 + $0x128] sm:$0xf0] }
  0xd7   : > { %3372 = vmatmul.msk.bf16.gmra.mxu2 %vm1222_vm0, %v4599_v41  ;;  %v4634_v62 = vor.u32 %v3610_v50, %v2864_v47  ;;  %v3129_v33 = vor.u32 %v3675_v17, %v3126_v32 }
  0xd8   : > { %1608 = vmatmul.bf16.gmra.mxu3 %v4278_v24  ;;  %5547 = vst [vmem:[#allocation12_spill] sm:$0xff] %v4632_v56 }
  0xd9   : > { %5548 = vst [vmem:[#allocation13_spill] sm:$0xff] %v4634_v62  ;;  %1693 = vmatpush.bf16.msra.mxu1 %v3129_v33 }
  0xda   : > { %v1364_v4 = vpop.f32.mrf.mxu2  ;;  %v1268_v10 = vpop.f32.mrf.mxu0 }
  0xdb   : > { %v1365_v5 = vadd.f32 %v1364_v4, %v1316_v52  ;;  %v1413_v24 = vpop.f32.mrf.mxu3  ;;  %v1269_v11 = vadd.f32 %v1268_v10, %v4519_v12  ;;  %v1317_v13 = vpop.f32.mrf.mxu1 }
  0xdd   : > { %v4622_v14 = vadd.f32 %v1413_v24, %v1365_v5  ;;  %v1318_v16 = vadd.f32 %v1317_v13, %v1269_v11  ;;  %v3659_v11 = vld [vmem:[%s5513_s1 + $0xa4] sm:$0xf]  ;;  %v3062_v13 = vld [vmem:[%s5513_s1 + $0xa8] sm:$0xf0] }
  0xe2   : > { %v1366_v54 = vpop.f32.mrf.mxu2  ;;  %v1271_v52 = vpop.f32.mrf.mxu0 }
  0xe3   : > { %v1367_v55 = vadd.f32 %v1366_v54, %v1318_v16  ;;  %v1415_v6 = vpop.f32.mrf.mxu3  ;;  %v1272_v4 = vadd.f32 %v1271_v52, %v4519_v12  ;;  %v1320_v5 = vpop.f32.mrf.mxu1  ;;  %v3065_v16 = vor.u32 %v3659_v11, %v3062_v13  ;;  %v3613_v11 = vld [vmem:[%s4192_s14 + $0xf4] sm:$0xf]  ;;  %v2886_v13 = vld [vmem:[%s4192_s14 + $0x10c] sm:$0xf0] }
  0xe4   : > { %v4667_v41 = vor.u32 %v3613_v11, %v2886_v13  ;;  %v3673_v13 = vld [vmem:[%s5513_s1 + $0x114] sm:$0xf] }
  0xe5   : > { %v4637_v10 = vadd.f32 %v1415_v6, %v1367_v55  ;;  %v1321_v24 = vadd.f32 %v1320_v5, %v1272_v4  ;;  %1466 = vmatmul.bf16.gmra.mxu0 %v4630_v43  ;;  %v2884_v4 = vld [vmem:[%s4192_s14 + $0xf0] sm:$0xf]  ;;  %v3616_v5 = vld [vmem:[%s4192_s14 + $0x108] sm:$0xf0] }
  0xe6   : > { %1515 = vmatmul.bf16.gmra.mxu1 %v4632_v56  ;;  %1644 = vmatpush.bf16.msra.mxu0 %v3065_v16  ;;  %v3617_v56 = vld [vmem:[%s4192_s14 + $0x110] sm:$0xf0]  ;;  %v4665_v32 = vor.u32 %v3616_v5, %v2884_v4  ;;  %5549 = vst [vmem:[#allocation14_spill] sm:$0xff] %v4667_v41 }
  0xe7   : > { %3373 = vmatmul.msk.bf16.gmra.mxu2 %vm1222_vm0, %v4634_v62  ;;  %v2892_v62 = vld [vmem:[%s4192_s14 + $0xf8] sm:$0xf]  ;;  %v3717_v5 = vld [vmem:[%s5513_s1 + $0x274] sm:$0xf] }
  0xe8   : > { %1613 = vmatmul.bf16.gmra.mxu3 %v4310_v42  ;;  %v4669_v33 = vor.u32 %v3617_v56, %v2892_v62  ;;  %v3657_v56 = vld [vmem:[%s5513_s1 + $0x94] sm:$0xf]  ;;  %v3054_v62 = vld [vmem:[%s5513_s1 + $0x98] sm:$0xf0] }
  0xe9   : > { %v3057_v11 = vor.u32 %v3657_v56, %v3054_v62 }
  0xea   : > { %v1369_v36 = vpop.f32.mrf.mxu2  ;;  %v1273_v50 = vpop.f32.mrf.mxu0  ;;  %5550 = vst [vmem:[#allocation15_spill] sm:$0xff] %v4669_v33 }
  0xeb   : > { %v1370_v47 = vadd.f32 %v1369_v36, %v1321_v24  ;;  %v1418_v42 = vpop.f32.mrf.mxu3  ;;  %v1274_v54 = vadd.f32 %v1273_v50, %v4519_v12  ;;  %v1322_v55 = vpop.f32.mrf.mxu1  ;;  %1645 = vmatpush.bf16.msra.mxu0 %v3057_v11 }
  0xed   : > { %v4657_v52 = vadd.f32 %v1418_v42, %v1370_v47  ;;  %v1323_v6 = vadd.f32 %v1322_v55, %v1274_v54  ;;  %v3701_v55 = vld [vmem:[%s5513_s1 + $0x1f4] sm:$0xf] }
  0xf2   : > { %v1371_v17 = vpop.f32.mrf.mxu2  ;;  %v1276_v24 = vpop.f32.mrf.mxu0 }
  0xf3   : > { %v1372_v16 = vadd.f32 %v1371_v17, %v1323_v6  ;;  %v1420_v36 = vpop.f32.mrf.mxu3  ;;  %v1277_v47 = vadd.f32 %v1276_v24, %v4519_v12  ;;  %v1325_v50 = vpop.f32.mrf.mxu1  ;;  %v3230_v6 = vld [vmem:[%s5513_s1 + $0x1f8] sm:$0xf0] }
  0xf4   : > { %v3233_v4 = vor.u32 %v3701_v55, %v3230_v6  ;;  %v3118_v17 = vld [vmem:[%s5513_s1 + $0x118] sm:$0xf0] }
  0xf5   : > { %v4672_v42 = vadd.f32 %v1420_v36, %v1372_v16  ;;  %v1326_v54 = vadd.f32 %v1325_v50, %v1277_v47  ;;  %1471 = vmatmul.bf16.gmra.mxu0 %v4665_v32  ;;  %v3294_v16 = vld [vmem:[%s5513_s1 + $0x278] sm:$0xf0]  ;;  %v3121_v24 = vor.u32 %v3673_v13, %v3118_v17  ;;  %v3222_v47 = vld [vmem:[%s5513_s1 + $0x1e8] sm:$0xf0] }
  0xf6   : > { %1520 = vmatmul.bf16.gmra.mxu1 %v4667_v41  ;;  %1737 = vmatpush.bf16.msra.mxu2 %v3233_v4  ;;  %v3297_v36 = vor.u32 %v3717_v5, %v3294_v16  ;;  %v3715_v4 = vld [vmem:[%s5513_s1 + $0x264] sm:$0xf]  ;;  %v3286_v5 = vld [vmem:[%s5513_s1 + $0x268] sm:$0xf0]  ;;  %v3697_v16 = vld [vmem:[%s5513_s1 + $0x1d4] sm:$0xf] }
  0xf7   : > { %3374 = vmatmul.msk.bf16.gmra.mxu2 %vm1222_vm0, %v4669_v33  ;;  %1694 = vmatpush.bf16.msra.mxu1 %v3121_v24  ;;  %v3214_v24 = vld [vmem:[%s5513_s1 + $0x1d8] sm:$0xf0] }
  0xf8   : > { %1618 = vmatmul.bf16.gmra.mxu3 %v4342_v0  ;;  %v3699_v0 = vld [vmem:[%s5513_s1 + $0x1e4] sm:$0xf] }
  0xf9   : > { %v3225_v55 = vor.u32 %v3699_v0, %v3222_v47  ;;  %1786 = vmatpush.bf16.msra.mxu3 %v3297_v36  ;;  %v2912_v0 = vld [vmem:[%s4192_s14 + $0x128] sm:$0xf]  ;;  %v3623_v47 = vld [vmem:[%s4192_s14 + $0x140] sm:$0xf0] }
  0xfa   : > { %v1374_v50 = vpop.f32.mrf.mxu2  ;;  %v1278_v56 = vpop.f32.mrf.mxu0 }
  0xfb   : > { %v1375_v6 = vadd.f32 %v1374_v50, %v1326_v54  ;;  %v1423_v62 = vpop.f32.mrf.mxu3  ;;  %v1279_v11 = vadd.f32 %v1278_v56, %v4519_v12  ;;  %v1327_v13 = vpop.f32.mrf.mxu1  ;;  %v3289_v54 = vor.u32 %v3715_v4, %v3286_v5  ;;  %1738 = vmatpush.bf16.msra.mxu2 %v3225_v55  ;;  %v3217_v50 = vor.u32 %v3697_v16, %v3214_v24  ;;  %v3620_v56 = vld [vmem:[%s4192_s14 + $0x12c] sm:$0xf]  ;;  %v3278_v55 = vld [vmem:[%s5513_s1 + $0x258] sm:$0xf0]  ;;  %v2920_v4 = vld [vmem:[%s4192_s14 + $0x130] sm:$0xf] }
  0xfc   : > { %v3624_v5 = vld [vmem:[%s4192_s14 + $0x148] sm:$0xf0]  ;;  %v4742_v16 = vor.u32 %v3623_v47, %v2912_v0 }
  0xfd   : > { %v4716_v17 = vadd.f32 %v1423_v62, %v1375_v6  ;;  %v1328_v36 = vadd.f32 %v1327_v13, %v1279_v11  ;;  %1787 = vmatpush.bf16.msra.mxu3 %v3289_v54  ;;  %v3713_v6 = vld [vmem:[%s5513_s1 + $0x254] sm:$0xf]  ;;  %v2914_v62 = vld [vmem:[%s4192_s14 + $0x144] sm:$0xf0]  ;;  %v3695_v11 = vld [vmem:[%s5513_s1 + $0x1c4] sm:$0xf]  ;;  %v4746_v30 = vor.u32 %v3624_v5, %v2920_v4 }
  0xfe   : > { %v3281_v33 = vor.u32 %v3713_v6, %v3278_v55  ;;  %v3206_v13 = vld [vmem:[%s5513_s1 + $0x1c8] sm:$0xf0]  ;;  %v4744_v23 = vor.u32 %v3620_v56, %v2914_v62  ;;  %v3198_v62 = vld [vmem:[%s5513_s1 + $0x1b8] sm:$0xf0]  ;;  %v3709_v4 = vld [vmem:[%s5513_s1 + $0x234] sm:$0xf] }
  0xff   : > { %1739 = vmatpush.bf16.msra.mxu2 %v3217_v50  ;;  %v3209_v24 = vor.u32 %v3695_v11, %v3206_v13  ;;  %5552 = vst [vmem:[#allocation17_spill] sm:$0xff] %v4746_v30  ;;  %v3711_v50 = vld [vmem:[%s5513_s1 + $0x244] sm:$0xf]  ;;  %v3270_v6 = vld [vmem:[%s5513_s1 + $0x248] sm:$0xf0] }
 0x100   : > { %5551 = vst [vmem:[#allocation16_spill] sm:$0xff] %v4744_v23  ;;  %v3671_v11 = vld [vmem:[%s5513_s1 + $0x104] sm:$0xf]  ;;  %v3110_v13 = vld [vmem:[%s5513_s1 + $0x108] sm:$0xf0] }
 0x101   : > { %1788 = vmatpush.bf16.msra.mxu3 %v3281_v33  ;;  %v3693_v33 = vld [vmem:[%s5513_s1 + $0x1b4] sm:$0xf] }
 0x102   : > { %v1376_v54 = vpop.f32.mrf.mxu2  ;;  %v1281_v37 = vpop.f32.mrf.mxu0 }
 0x103   : > { %v1377_v41 = vadd.f32 %v1376_v54, %v1328_v36  ;;  %v1425_v31 = vpop.f32.mrf.mxu3  ;;  %v1282_v0 = vadd.f32 %v1281_v37, %v4519_v12  ;;  %v1330_v47 = vpop.f32.mrf.mxu1  ;;  %1740 = vmatpush.bf16.msra.mxu2 %v3209_v24  ;;  %v3273_v36 = vor.u32 %v3711_v50, %v3270_v6  ;;  %v3046_v37 = vld [vmem:[%s5513_s1 + $0x88] sm:$0xf0]  ;;  %v3262_v54 = vld [vmem:[%s5513_s1 + $0x238] sm:$0xf0]  ;;  %v3113_v24 = vor.u32 %v3671_v11, %v3110_v13  ;;  %v3689_v11 = vld [vmem:[%s5513_s1 + $0x194] sm:$0xf] }
 0x104   : > { %v3265_v50 = vor.u32 %v3709_v4, %v3262_v54  ;;  %v3190_v6 = vld [vmem:[%s5513_s1 + $0x1a8] sm:$0xf0]  ;;  %v3182_v13 = vld [vmem:[%s5513_s1 + $0x198] sm:$0xf0] }
 0x105   : > { %v4755_v55 = vadd.f32 %v1425_v31, %v1377_v41  ;;  %v1331_v56 = vadd.f32 %v1330_v47, %v1282_v0  ;;  %1476 = vmatmul.bf16.gmra.mxu0 %v4742_v16  ;;  %v3655_v31 = vld [vmem:[%s5513_s1 + $0x84] sm:$0xf]  ;;  %v3201_v41 = vor.u32 %v3693_v33, %v3198_v62  ;;  %1789 = vmatpush.bf16.msra.mxu3 %v3273_v36 }
 0x106   : > { %1525 = vmatmul.bf16.gmra.mxu1 %v4744_v23  ;;  %v3049_v5 = vor.u32 %v3655_v31, %v3046_v37  ;;  %v3707_v36 = vld [vmem:[%s5513_s1 + $0x224] sm:$0xf]  ;;  %v3254_v37 = vld [vmem:[%s5513_s1 + $0x228] sm:$0xf0] }
 0x107   : > { %3375 = vmatmul.msk.bf16.gmra.mxu2 %vm1222_vm0, %v4746_v30  ;;  %1695 = vmatpush.bf16.msra.mxu1 %v3113_v24  ;;  %v2940_v24 = vld [vmem:[%s4192_s14 + $0x160] sm:$0xf] }
 0x108   : > { %1623 = vmatmul.bf16.gmra.mxu3 %v4392_v35  ;;  %1741 = vmatpush.bf16.msra.mxu2 %v3201_v41  ;;  %v3691_v35 = vld [vmem:[%s5513_s1 + $0x1a4] sm:$0xf] }
 0x109   : > { %1646 = vmatpush.bf16.msra.mxu0 %v3049_v5  ;;  %v3193_v47 = vor.u32 %v3691_v35, %v3190_v6  ;;  %1790 = vmatpush.bf16.msra.mxu3 %v3265_v50  ;;  %v3257_v5 = vor.u32 %v3707_v36, %v3254_v37  ;;  %v3630_v35 = vld [vmem:[%s4192_s14 + $0x178] sm:$0xf0]  ;;  %v3185_v6 = vor.u32 %v3689_v11, %v3182_v13  ;;  %v3687_v37 = vld [vmem:[%s5513_s1 + $0x184] sm:$0xf] }
 0x10a   : > { %v1379_v0 = vpop.f32.mrf.mxu2  ;;  %v1283_v62 = vpop.f32.mrf.mxu0  ;;  %v3246_v50 = vld [vmem:[%s5513_s1 + $0x218] sm:$0xf0]  ;;  %v4825_v11 = vor.u32 %v3630_v35, %v2940_v24 }
 0x10b   : > { %v1380_v33 = vadd.f32 %v1379_v0, %v1331_v56  ;;  %v1428_v31 = vpop.f32.mrf.mxu3  ;;  %v1284_v41 = vadd.f32 %v1283_v62, %v4519_v12  ;;  %v1332_v4 = vpop.f32.mrf.mxu1  ;;  %v3627_v0 = vld [vmem:[%s4192_s14 + $0x164] sm:$0xf]  ;;  %v2948_v62 = vld [vmem:[%s4192_s14 + $0x168] sm:$0xf] }
 0x10c   : > { %1742 = vmatpush.bf16.msra.mxu2 %v3193_v47  ;;  %v2942_v47 = vld [vmem:[%s4192_s14 + $0x17c] sm:$0xf0] }
 0x10d   : > { %v4799_v56 = vadd.f32 %v1428_v31, %v1380_v33  ;;  %v1333_v54 = vadd.f32 %v1332_v4, %v1284_v41  ;;  %v3705_v33 = vld [vmem:[%s5513_s1 + $0x214] sm:$0xf]  ;;  %v3631_v31 = vld [vmem:[%s4192_s14 + $0x180] sm:$0xf0]  ;;  %1791 = vmatpush.bf16.msra.mxu3 %v3257_v5  ;;  %v3174_v41 = vld [vmem:[%s5513_s1 + $0x188] sm:$0xf0]  ;;  %v4827_v60 = vor.u32 %v3627_v0, %v2942_v47 }
 0x10e   : > { %v3249_v36 = vor.u32 %v3705_v33, %v3246_v50  ;;  %v3177_v13 = vor.u32 %v3687_v37, %v3174_v41  ;;  %v4829_v5 = vor.u32 %v3631_v31, %v2948_v62  ;;  %v3238_v33 = vld [vmem:[%s5513_s1 + $0x208] sm:$0xf0]  ;;  %v3733_v47 = vld [vmem:[%s5513_s1 + $0x2f4] sm:$0xf] }
 0x10f   : > { %5553 = vst [vmem:[#allocation18_spill] sm:$0xff] %v4827_v60  ;;  %v3366_v62 = vld [vmem:[%s5513_s1 + $0x308] sm:$0xf0] }
 0x110   : > { %1743 = vmatpush.bf16.msra.mxu2 %v3185_v6  ;;  %5554 = vst [vmem:[#allocation19_spill] sm:$0xff] %v4829_v5  ;;  %v3703_v6 = vld [vmem:[%s5513_s1 + $0x204] sm:$0xf] }
 0x111   : > { %1792 = vmatpush.bf16.msra.mxu3 %v3249_v36 }
 0x112   : > { %v1381_v4 = vpop.f32.mrf.mxu2  ;;  %v1286_v23 = vpop.f32.mrf.mxu0 }
 0x113   : > { %v1382_v30 = vadd.f32 %v1381_v4, %v1333_v54  ;;  %v1430_v28 = vpop.f32.mrf.mxu3  ;;  %v1287_v50 = vadd.f32 %v1286_v23, %v4519_v12  ;;  %v1335_v24 = vpop.f32.mrf.mxu1  ;;  %v3241_v54 = vor.u32 %v3703_v6, %v3238_v33  ;;  %v3735_v23 = vld [vmem:[%s5513_s1 + $0x304] sm:$0xf] }
 0x114   : > { %1744 = vmatpush.bf16.msra.mxu2 %v3177_v13  ;;  %v3369_v31 = vor.u32 %v3735_v23, %v3366_v62 }
 0x115   : > { %v4838_v35 = vadd.f32 %v1430_v28, %v1382_v30  ;;  %v1336_v0 = vadd.f32 %v1335_v24, %v1287_v50  ;;  %1481 = vmatmul.bf16.gmra.mxu0 %v4825_v11  ;;  %v3358_v28 = vld [vmem:[%s5513_s1 + $0x2f8] sm:$0xf0]  ;;  %1793 = vmatpush.bf16.msra.mxu3 %v3241_v54  ;;  %v2968_v50 = vld [vmem:[%s4192_s14 + $0x198] sm:$0xf]  ;;  %v3637_v24 = vld [vmem:[%s4192_s14 + $0x1b0] sm:$0xf0] }
 0x116   : > { %1530 = vmatmul.bf16.gmra.mxu1 %v4827_v60  ;;  %v3361_v30 = vor.u32 %v3733_v47, %v3358_v28  ;;  %v3634_v47 = vld [vmem:[%s4192_s14 + $0x19c] sm:$0xf]  ;;  %v2970_v28 = vld [vmem:[%s4192_s14 + $0x1b4] sm:$0xf0]  ;;  %v2976_v54 = vld [vmem:[%s4192_s14 + $0x1a0] sm:$0xf]  ;;  %v4866_v62 = vor.u32 %v3637_v24, %v2968_v50 }
 0x117   : > { %3376 = vmatmul.msk.bf16.gmra.mxu2 %vm1222_vm0, %v4829_v5  ;;  %1891 = vmatpush.bf16.msrb.mxu1 %v3369_v31  ;;  %v3638_v5 = vld [vmem:[%s4192_s14 + $0x1b8] sm:$0xf0]  ;;  %v4868_v60 = vor.u32 %v3634_v47, %v2970_v28  ;;  %s5445_s14 = scalar_lea.vmem [#allocation2], %s2751_s23 }
 0x118   : > { %1628 = vmatmul.bf16.gmra.mxu3 %v4454_v20  ;;  %1835 = vmatpush.bf16.msrb.mxu0 %v3361_v30  ;;  %5555 = vst [vmem:[#allocation20_spill] sm:$0xff] %v4866_v62  ;;  %v4870_v31 = vor.u32 %v3638_v5, %v2976_v54  ;;  %v3350_v5 = vld [vmem:[%s5513_s1 + $0x2e8] sm:$0xf0]  ;;  %s2682_s15 = sshll.u32 %s5445_s14, 4  ;;  %s2683_s15 = int_to_ptr.vmem [resolvable:$true] %s2682_s15 }
 0x119   : > { %5556 = vst [vmem:[#allocation21_spill] sm:$0xff] %v4868_v60 }
 0x11a   : > { %v1384_v36 = vpop.f32.mrf.mxu2  ;;  %v1288_v37 = vpop.f32.mrf.mxu0  ;;  %5557 = vst [vmem:[#allocation22_spill] sm:$0xff] %v4870_v31 }
 0x11b   : > { %v1385_v20 = vadd.f32 %v1384_v36, %v1336_v0  ;;  %v1433_v41 = vpop.f32.mrf.mxu3  ;;  %v1289_v4 = vadd.f32 %v1288_v37, %v4519_v12  ;;  %v1337_v13 = vpop.f32.mrf.mxu1 }
 0x11d   : > { %v4858_v6 = vadd.f32 %v1433_v41, %v1385_v20  ;;  %v1338_v33 = vadd.f32 %v1337_v13, %v1289_v4  ;;  %v3731_v13 = vld [vmem:[%s5513_s1 + $0x2e4] sm:$0xf] }
 0x122   : > { %v1386_v23 = vpop.f32.mrf.mxu2  ;;  %v1291_v0 = vpop.f32.mrf.mxu0 }
 0x123   : > { %v1387_v30 = vadd.f32 %v1386_v23, %v1338_v33  ;;  %v1435_v36 = vpop.f32.mrf.mxu3  ;;  %v1292_v20 = vadd.f32 %v1291_v0, %v4519_v12  ;;  %v1340_v37 = vpop.f32.mrf.mxu1  ;;  %v3353_v33 = vor.u32 %v3731_v13, %v3350_v5 }
 0x125   : > { %v4873_v41 = vadd.f32 %v1435_v36, %v1387_v30  ;;  %v1341_v4 = vadd.f32 %v1340_v37, %v1292_v20  ;;  %1486 = vmatmul.bf16.gmra.mxu0 %v4866_v62 }
 0x126   : > { %1535 = vmatmul.bf16.gmra.mxu1 %v4868_v60  ;;  %1836 = vmatpush.bf16.msrb.mxu0 %v3353_v33 }
 0x127   : > { %3377 = vmatmul.msk.bf16.gmra.mxu2 %vm1222_vm0, %v4870_v31 }
 0x128   : > { %1633 = vmatmul.bf16.gmra.mxu3 %v4492_v57 }
 0x12a   : > { %v1389_v50 = vpop.f32.mrf.mxu2  ;;  %v1293_v47 = vpop.f32.mrf.mxu0 }
 0x12b   : > { %v1390_v24 = vadd.f32 %v1389_v50, %v1341_v4  ;;  %v1438_v28 = vpop.f32.mrf.mxu3  ;;  %v1294_v54 = vadd.f32 %v1293_v47, %v4519_v12  ;;  %v1342_v23 = vpop.f32.mrf.mxu1  ;;  %v3729_v12 = vld [vmem:[%s5513_s1 + $0x2d4] sm:$0xf]  ;;  %v3342_v4 = vld [vmem:[%s5513_s1 + $0x2d8] sm:$0xf0] }
 0x12d   : > { %v4887_v30 = vadd.f32 %v1438_v28, %v1390_v24  ;;  %v1343_v0 = vadd.f32 %v1342_v23, %v1294_v54 }
 0x132   : > { %v1391_v36 = vpop.f32.mrf.mxu2  ;;  %v1452_v31 = vpop.f32.mrf.mxu0 }
 0x133   : > { %v1392_v20 = vadd.f32 %v1391_v36, %v1343_v0  ;;  %v1440_v37 = vpop.f32.mrf.mxu3  ;;  %v1453_v60 = vadd.f32 %v1452_v31, %v4552_v61  ;;  %v1501_v62 = vpop.f32.mrf.mxu1  ;;  %v3345_v61 = vor.u32 %v3729_v12, %v3342_v4 }
 0x135   : > { %v4890_v57 = vadd.f32 %v1440_v37, %v1392_v20  ;;  %v1502_v13 = vadd.f32 %v1501_v62, %v1453_v60  ;;  %1647 = vmatmul.bf16.vlgmr.msra.gmra.mxu0 %v4211_v48 }
 0x136   : > { %1696 = vmatmul.bf16.vlgmr.msra.gmra.mxu1 %v4213_v49  ;;  %1837 = vmatpush.bf16.msrb.mxu0 %v3345_v61 }
 0x137   : > { %1745 = vmatmul.bf16.vlgmr.msra.gmra.mxu2 %v4220_v53 }
 0x138   : > { %1794 = vmatmul.bf16.vlgmr.msra.gmra.mxu3 %v4527_v19 }
 0x13a   : > { %v1550_v31 = vpop.f32.mrf.mxu2  ;;  %v1454_v62 = vpop.f32.mrf.mxu0 }
 0x13b   : > { %v1551_v60 = vadd.f32 %v1550_v31, %v1502_v13  ;;  %v1455_v48 = vadd.f32 %v1454_v62, %v4567_v34  ;;  %v1503_v49 = vpop.f32.mrf.mxu1  ;;  %v3727_v34 = vld [vmem:[%s5513_s1 + $0x2c4] sm:$0xf] }
 0x13d   : > { %v1504_v5 = vadd.f32 %v1503_v49, %v1455_v48  ;;  %v1933_v28 = vmax.f32 %v1551_v60, 0.0 }
 0x142   : > { %v1552_v53 = vpop.f32.mrf.mxu2  ;;  %v1457_v50 = vpop.f32.mrf.mxu0 }
 0x143   : > { %v1553_v33 = vadd.f32 %v1552_v53, %v1504_v5  ;;  %v1458_v24 = vadd.f32 %v1457_v50, %v4587_v63  ;;  %v1506_v47 = vpop.f32.mrf.mxu1  ;;  %v3334_v63 = vld [vmem:[%s5513_s1 + $0x2c8] sm:$0xf0]  ;;  %v4931_v50 = vpop.f32.mrf.mxu3 }
 0x144   : > { %v3337_v0 = vor.u32 %v3727_v34, %v3334_v63 }
 0x145   : > { %v1935_v54 = vmax.f32 %v1553_v33, 0.0  ;;  %v1507_v23 = vadd.f32 %v1506_v47, %v1458_v24  ;;  %1652 = vmatmul.bf16.gmra.mxu0 %v4248_v7 }
 0x146   : > { %1701 = vmatmul.bf16.gmra.mxu1 %v4250_v8  ;;  %1838 = vmatpush.bf16.msrb.mxu0 %v3337_v0  ;;  %v3318_v0 = vld [vmem:[%s5513_s1 + $0x2a8] sm:$0xf0] }
 0x147   : > { %v4905_v19 = vpack.c.bf16 %v1935_v54, %v1933_v28  ;;  %1750 = vmatmul.bf16.gmra.mxu2 %v4252_v9 }
 0x148   : > { %1799 = vmatmul.bf16.gmra.mxu3 %v4560_v15  ;;  %v3725_v15 = vld [vmem:[%s5513_s1 + $0x2b4] sm:$0xf] }
 0x14a   : > { %v1555_v36 = vpop.f32.mrf.mxu2  ;;  %v1459_v20 = vpop.f32.mrf.mxu0 }
 0x14b   : > { %v1556_v7 = vadd.f32 %v1555_v36, %v1507_v23  ;;  %v1460_v37 = vadd.f32 %v1459_v20, %v4602_v51  ;;  %v1508_v8 = vpop.f32.mrf.mxu1  ;;  %v3326_v51 = vld [vmem:[%s5513_s1 + $0x2b8] sm:$0xf0] }
 0x14d   : > { %v1509_v13 = vadd.f32 %v1508_v8, %v1460_v37  ;;  %v1937_v60 = vmax.f32 %v1556_v7, 0.0 }
 0x152   : > { %v1557_v9 = vpop.f32.mrf.mxu2  ;;  %v1462_v4 = vpop.f32.mrf.mxu0 }
 0x153   : > { %v1558_v12 = vadd.f32 %v1557_v9, %v1509_v13  ;;  %v1463_v61 = vadd.f32 %v1462_v4, %v4622_v14  ;;  %v1511_v31 = vpop.f32.mrf.mxu1  ;;  %v3329_v14 = vor.u32 %v3725_v15, %v3326_v51  ;;  %v3310_v51 = vld [vmem:[%s5513_s1 + $0x298] sm:$0xf0] }
 0x155   : > { %v1939_v62 = vmax.f32 %v1558_v12, 0.0  ;;  %v1512_v48 = vadd.f32 %v1511_v31, %v1463_v61  ;;  %1657 = vmatmul.bf16.gmra.mxu0 %v4280_v25 }
 0x156   : > { %1706 = vmatmul.bf16.gmra.mxu1 %v4282_v26  ;;  %1839 = vmatpush.bf16.msrb.mxu0 %v3329_v14 }
 0x157   : > { %1755 = vmatmul.bf16.gmra.mxu2 %v4284_v27  ;;  %v4927_v49 = vpack.c.bf16 %v1939_v62, %v1937_v60  ;;  %v3752_v62 = vld [vmem:[%s5515_s3 + $0x74] sm:$0xf0] }
 0x158   : > { %1804 = vmatmul.bf16.gmra.mxu3 %v4595_v18 }
 0x15a   : > { %v1560_v5 = vpop.f32.mrf.mxu2  ;;  %v1464_v53 = vpop.f32.mrf.mxu0 }
 0x15b   : > { %v1561_v25 = vadd.f32 %v1560_v5, %v1512_v48  ;;  %v1465_v26 = vadd.f32 %v1464_v53, %v4637_v10  ;;  %v1513_v27 = vpop.f32.mrf.mxu1  ;;  %v3723_v10 = vld [vmem:[%s5513_s1 + $0x2a4] sm:$0xf] }
 0x15d   : > { %v1514_v33 = vadd.f32 %v1513_v27, %v1465_v26  ;;  %v1941_v34 = vmax.f32 %v1561_v25, 0.0 }
 0x162   : > { %v1562_v24 = vpop.f32.mrf.mxu2  ;;  %v1467_v28 = vpop.f32.mrf.mxu0 }
 0x163   : > { %v1563_v47 = vadd.f32 %v1562_v24, %v1514_v33  ;;  %v1468_v54 = vadd.f32 %v1467_v28, %v4657_v52  ;;  %v1516_v23 = vpop.f32.mrf.mxu1  ;;  %v3321_v52 = vor.u32 %v3723_v10, %v3318_v0  ;;  %v3748_v24 = vld [vmem:[%s5515_s3 + $0x54] sm:$0xf0] }
 0x165   : > { %v1943_v63 = vmax.f32 %v1563_v47, 0.0  ;;  %v1517_v18 = vadd.f32 %v1516_v23, %v1468_v54  ;;  %1662 = vmatmul.bf16.gmra.mxu0 %v4312_v44  ;;  %v3420_v23 = vld [vmem:[%s5515_s3 + $0x40] sm:$0xf] }
 0x166   : > { %1711 = vmatmul.bf16.gmra.mxu1 %v4314_v45  ;;  %1840 = vmatpush.bf16.msrb.mxu0 %v3321_v52  ;;  %v4946_v45 = vpop.f32.mrf.mxu3 }
 0x167   : > { %1760 = vmatmul.bf16.gmra.mxu2 %v4316_v46  ;;  %v4943_v36 = vpack.c.bf16 %v1943_v63, %v1941_v34 }
 0x168   : > { %1809 = vmatmul.bf16.gmra.mxu3 %v4630_v43  ;;  %v3444_v43 = vld [vmem:[%s5515_s3 + $0x70] sm:$0xf] }
 0x169   : > { %v3445_v15 = vor.u32 %v3752_v62, %v3444_v43  ;;  %v3396_v62 = vld [vmem:[%s5515_s3 + $0x10] sm:$0xf] }
 0x16a   : > { %v1565_v7 = vpop.f32.mrf.mxu2  ;;  %v1469_v20 = vpop.f32.mrf.mxu0 }
 0x16b   : > { %v1566_v44 = vadd.f32 %v1565_v7, %v1517_v18  ;;  %v1470_v46 = vadd.f32 %v1469_v20, %v4672_v42  ;;  %v1518_v37 = vpop.f32.mrf.mxu1  ;;  %2179 = vmatpush.bf16.msrb.mxu2 %v3445_v15  ;;  %v3412_v20 = vld [vmem:[%s5515_s3 + $0x30] sm:$0xf] }
 0x16d   : > { %v1519_v8 = vadd.f32 %v1518_v37, %v1470_v46  ;;  %v1945_v31 = vmax.f32 %v1566_v44, 0.0  ;;  %v3744_v46 = vld [vmem:[%s5515_s3 + $0x34] sm:$0xf0] }
 0x16e   : > { %v4956_v48 = vpop.f32.mrf.mxu3 }
 0x172   : > { %v1567_v13 = vpop.f32.mrf.mxu2  ;;  %v1472_v12 = vpop.f32.mrf.mxu0 }
 0x173   : > { %v1568_v9 = vadd.f32 %v1567_v13, %v1519_v8  ;;  %v1473_v4 = vadd.f32 %v1472_v12, %v4716_v17  ;;  %v1521_v61 = vpop.f32.mrf.mxu1  ;;  %v3721_v17 = vld [vmem:[%s5513_s1 + $0x294] sm:$0xf]  ;;  %v3413_v8 = vor.u32 %v3744_v46, %v3412_v20  ;;  %v3302_v13 = vld [vmem:[%s5513_s1 + $0x288] sm:$0xf0] }
 0x174   : > { %v3313_v5 = vor.u32 %v3721_v17, %v3310_v51  ;;  %v3388_v51 = vld [vmem:[%s5515_s3] sm:$0xf] }
 0x175   : > { %v1947_v60 = vmax.f32 %v1568_v9, 0.0  ;;  %v1522_v42 = vadd.f32 %v1521_v61, %v1473_v4  ;;  %1667 = vmatmul.bf16.gmra.mxu0 %v4344_v1  ;;  %v3436_v1 = vld [vmem:[%s5515_s3 + $0x60] sm:$0xf] }
 0x176   : > { %1716 = vmatmul.bf16.gmra.mxu1 %v4346_v2  ;;  %v3750_v2 = vld [vmem:[%s5515_s3 + $0x64] sm:$0xf0]  ;;  %1841 = vmatpush.bf16.msrb.mxu0 %v3313_v5  ;;  %v4983_v54 = vpop.f32.mrf.mxu3 }
 0x177   : > { %1765 = vmatmul.bf16.gmra.mxu2 %v4348_v3  ;;  %v4967_v14 = vpack.c.bf16 %v1947_v60, %v1945_v31  ;;  %v3437_v25 = vor.u32 %v3750_v2, %v3436_v1 }
 0x178   : > { %1814 = vmatmul.bf16.gmra.mxu3 %v4665_v32  ;;  %v3428_v32 = vld [vmem:[%s5515_s3 + $0x50] sm:$0xf] }
 0x179   : > { %2180 = vmatpush.bf16.msrb.mxu2 %v3437_v25  ;;  %v3429_v28 = vor.u32 %v3748_v24, %v3428_v32 }
 0x17a   : > { %v1570_v3 = vpop.f32.mrf.mxu2  ;;  %v1474_v26 = vpop.f32.mrf.mxu0 }
 0x17b   : > { %v1571_v53 = vadd.f32 %v1570_v3, %v1522_v42  ;;  %v1475_v27 = vadd.f32 %v1474_v26, %v4755_v55  ;;  %v1523_v33 = vpop.f32.mrf.mxu1  ;;  %v3746_v55 = vld [vmem:[%s5515_s3 + $0x44] sm:$0xf0]  ;;  %v3740_v42 = vld [vmem:[%s5515_s3 + $0x14] sm:$0xf0] }
 0x17c   : > { %v3421_v63 = vor.u32 %v3746_v55, %v3420_v23  ;;  %v3397_v17 = vor.u32 %v3740_v42, %v3396_v62 }
 0x17d   : > { %v1524_v47 = vadd.f32 %v1523_v33, %v1475_v27  ;;  %2181 = vmatpush.bf16.msrb.mxu2 %v3429_v28  ;;  %v1949_v7 = vmax.f32 %v1571_v53, 0.0 }
 0x181   : > { %2182 = vmatpush.bf16.msrb.mxu2 %v3421_v63 }
 0x182   : > { %v1572_v34 = vpop.f32.mrf.mxu2  ;;  %v1477_v10 = vpop.f32.mrf.mxu0 }
 0x183   : > { %v1573_v18 = vadd.f32 %v1572_v34, %v1524_v47  ;;  %v1478_v0 = vadd.f32 %v1477_v10, %v4799_v56  ;;  %v1526_v52 = vpop.f32.mrf.mxu1  ;;  %v3719_v56 = vld [vmem:[%s5513_s1 + $0x284] sm:$0xf] }
 0x184   : > { %v3305_v12 = vor.u32 %v3719_v56, %v3302_v13  ;;  %v3751_v13 = vld [vmem:[%s5515_s3 + $0x74] sm:$0xf] }
 0x185   : > { %v1951_v44 = vmax.f32 %v1573_v18, 0.0  ;;  %v1527_v37 = vadd.f32 %v1526_v52, %v1478_v0  ;;  %1672 = vmatmul.bf16.gmra.mxu0 %v4400_v38  ;;  %2183 = vmatpush.bf16.msrb.mxu2 %v3413_v8  ;;  %v3404_v38 = vld [vmem:[%s5515_s3 + $0x20] sm:$0xf] }
 0x186   : > { %1721 = vmatmul.bf16.gmra.mxu1 %v4402_v39  ;;  %v3742_v39 = vld [vmem:[%s5515_s3 + $0x24] sm:$0xf0]  ;;  %1842 = vmatpush.bf16.msrb.mxu0 %v3305_v12  ;;  %v3829_v12 = vld [vmem:[%s5514_s2] sm:$0x3] }
 0x187   : > { %1770 = vmatmul.bf16.gmra.mxu2 %v4404_v40  ;;  %v5007_v9 = vpack.c.bf16 %v1951_v44, %v1949_v7  ;;  %v5016_v40 = vpop.f32.mrf.mxu3  ;;  %v3405_v61 = vor.u32 %v3742_v39, %v3404_v38  ;;  %v5558_v44 = vld [vmem:[#allocation5_spill] sm:$0xff]  ;;  %v5067_v38 = vperm.slane %v3829_v12, 1 }
 0x188   : > { %1819 = vmatmul.bf16.gmra.mxu3 %v4742_v16 }
 0x189   : > { %2184 = vmatpush.bf16.msrb.mxu2 %v3405_v61  ;;  %v1600_v62 = vadd.f32 %v4931_v50, %v5067_v38  ;;  %v5561_v50 = vld [vmem:[#allocation7_spill] sm:$0xff] }
 0x18a   : > { %v1575_v4 = vpop.f32.mrf.mxu2  ;;  %v1479_v60 = vpop.f32.mrf.mxu0 }
 0x18b   : > { %v1576_v31 = vadd.f32 %v1575_v4, %v1527_v37  ;;  %v1480_v43 = vadd.f32 %v1479_v60, %v4838_v35  ;;  %v1528_v16 = vpop.f32.mrf.mxu1  ;;  %v3738_v35 = vld [vmem:[%s5515_s3 + $0x4] sm:$0xf0]  ;;  %v5559_v37 = vld [vmem:[#allocation20_spill] sm:$0xff]  ;;  %v3767_v60 = vld [vmem:[%s5515_s3 + $0xf4] sm:$0xf] }
 0x18c   : > { %v3389_v1 = vor.u32 %v3738_v35, %v3388_v51 }
 0x18d   : > { %v1529_v15 = vadd.f32 %v1528_v16, %v1480_v43  ;;  %2185 = vmatpush.bf16.msrb.mxu2 %v3397_v17  ;;  %v1953_v27 = vmax.f32 %v1576_v31, 0.0  ;;  %v3510_v43 = vld [vmem:[%s5515_s3 + $0xf8] sm:$0xf0] }
 0x18e   : > { %v3513_v16 = vor.u32 %v3767_v60, %v3510_v43 }
 0x18f   : > { %v5031_v25 = vpop.f32.mrf.mxu3 }
 0x190   : > { %2326 = vmatpush.bf16.msra.mxu1 %v3513_v16 }
 0x191   : > { %2186 = vmatpush.bf16.msrb.mxu2 %v3389_v1 }
 0x192   : > { %v1577_v5 = vpop.f32.mrf.mxu2  ;;  %v1482_v3 = vpop.f32.mrf.mxu0 }
 0x193   : > { %v1578_v2 = vadd.f32 %v1577_v5, %v1529_v15  ;;  %v1483_v53 = vadd.f32 %v1482_v3, %v4858_v6  ;;  %v1531_v26 = vpop.f32.mrf.mxu1  ;;  %v3500_v3 = vld [vmem:[%s5515_s3 + $0xe0] sm:$0xf] }
 0x195   : > { %v1955_v33 = vmax.f32 %v1578_v2, 0.0  ;;  %v1532_v32 = vadd.f32 %v1531_v26, %v1483_v53  ;;  %1677 = vmatmul.bf16.gmra.mxu0 %v4456_v21  ;;  %v5560_v2 = vld [vmem:[#allocation6_spill] sm:$0xff] }
 0x196   : > { %1726 = vmatmul.bf16.gmra.mxu1 %v4458_v22  ;;  %v3766_v53 = vld [vmem:[%s5515_s3 + $0xe4] sm:$0xf0] }
 0x197   : > { %1775 = vmatmul.bf16.gmra.mxu2 %v4466_v29  ;;  %v5037_v24 = vpack.c.bf16 %v1955_v33, %v1953_v27  ;;  %v5041_v34 = vpop.f32.mrf.mxu3  ;;  %v3501_v26 = vor.u32 %v3766_v53, %v3500_v3  ;;  %v1602_v33 = vadd.f32 %v4946_v45, %v5067_v38  ;;  %v3765_v45 = vld [vmem:[%s5515_s3 + $0xe4] sm:$0xf]  ;;  %v5564_v53 = vld [vmem:[#allocation10_spill] sm:$0xff] }
 0x198   : > { %1824 = vmatmul.bf16.gmra.mxu3 %v4825_v11  ;;  %v3508_v11 = vld [vmem:[%s5515_s3 + $0xf0] sm:$0xf] }
 0x19a   : > { %v1580_v47 = vpop.f32.mrf.mxu2  ;;  %v1484_v23 = vpop.f32.mrf.mxu0 }
 0x19b   : > { %v1581_v28 = vadd.f32 %v1580_v47, %v1532_v32  ;;  %v1485_v6 = vadd.f32 %v1484_v23, %v4873_v41  ;;  %v1533_v55 = vpop.f32.mrf.mxu1  ;;  %v3768_v41 = vld [vmem:[%s5515_s3 + $0xf4] sm:$0xf0]  ;;  %v3749_v23 = vld [vmem:[%s5515_s3 + $0x64] sm:$0xf] }
 0x19c   : > { %v3509_v20 = vor.u32 %v3768_v41, %v3508_v11 }
 0x19d   : > { %v1534_v63 = vadd.f32 %v1533_v55, %v1485_v6  ;;  %v1957_v29 = vmax.f32 %v1581_v28, 0.0  ;;  %v3438_v6 = vld [vmem:[%s5515_s3 + $0x68] sm:$0xf0] }
 0x19e   : > { %2228 = vmatpush.bf16.msrb.mxu3 %v3509_v20 }
 0x19f   : > { %v5055_v46 = vpop.f32.mrf.mxu3 }
 0x1a2   : > { %v1582_v18 = vpop.f32.mrf.mxu2  ;;  %v1487_v21 = vpop.f32.mrf.mxu0  ;;  %2229 = vmatpush.bf16.msrb.mxu3 %v3501_v26  ;;  %v5565_v26 = vld [vmem:[#allocation11_spill] sm:$0xff] }
 0x1a3   : > { %v1583_v10 = vadd.f32 %v1582_v18, %v1534_v63  ;;  %v1488_v22 = vadd.f32 %v1487_v21, %v4887_v30  ;;  %v1536_v0 = vpop.f32.mrf.mxu1  ;;  %v3441_v18 = vor.u32 %v3749_v23, %v3438_v6  ;;  %v3502_v21 = vld [vmem:[%s5515_s3 + $0xe8] sm:$0xf0] }
 0x1a5   : > { %v1959_v52 = vmax.f32 %v1583_v10, 0.0  ;;  %v1537_v7 = vadd.f32 %v1536_v0, %v1488_v22  ;;  %1682 = vmatmul.bf16.gmra.mxu0 %v4494_v58  ;;  %v3505_v22 = vor.u32 %v3765_v45, %v3502_v21  ;;  %v1605_v0 = vadd.f32 %v4956_v48, %v5067_v38  ;;  %v3764_v48 = vld [vmem:[%s5515_s3 + $0xd4] sm:$0xf0] }
 0x1a6   : > { %1731 = vmatmul.bf16.gmra.mxu1 %v4496_v59  ;;  %v3446_v59 = vld [vmem:[%s5515_s3 + $0x78] sm:$0xf0] }
 0x1a7   : > { %1780 = vmatmul.bf16.gmra.mxu2 %v5558_v44  ;;  %v5053_v30 = vpack.c.bf16 %v1959_v52, %v1957_v29  ;;  %v3449_v61 = vor.u32 %v3751_v13, %v3446_v59  ;;  %v5108_v29 = vpop.f32.mrf.mxu3  ;;  %2327 = vmatpush.bf16.msra.mxu1 %v3505_v22  ;;  %v1607_v13 = vadd.f32 %v4983_v54, %v5067_v38  ;;  %v3763_v54 = vld [vmem:[%s5515_s3 + $0xd4] sm:$0xf]  ;;  %v3486_v22 = vld [vmem:[%s5515_s3 + $0xc8] sm:$0xf0] }
 0x1a8   : > { %1829 = vmatmul.bf16.gmra.mxu3 %v5559_v37  ;;  %v5562_v37 = vld [vmem:[#allocation8_spill] sm:$0xff] }
 0x1a9   : > { %2277 = vmatpush.bf16.msra.mxu0 %v3449_v61  ;;  %v3747_v61 = vld [vmem:[%s5515_s3 + $0x54] sm:$0xf] }
 0x1aa   : > { %v1585_v58 = vpop.f32.mrf.mxu2  ;;  %v1489_v56 = vpop.f32.mrf.mxu0 }
 0x1ab   : > { %v1586_v8 = vadd.f32 %v1585_v58, %v1537_v7  ;;  %v1490_v39 = vadd.f32 %v1489_v56, %v4890_v57  ;;  %v1538_v4 = vpop.f32.mrf.mxu1  ;;  %v3492_v58 = vld [vmem:[%s5515_s3 + $0xd0] sm:$0xf] }
 0x1ac   : > { %v3493_v56 = vor.u32 %v3764_v48, %v3492_v58 }
 0x1ad   : > { %v1539_v31 = vadd.f32 %v1538_v4, %v1490_v39  ;;  %v1961_v35 = vmax.f32 %v1586_v8, 0.0  ;;  %2278 = vmatpush.bf16.msra.mxu0 %v3441_v18  ;;  %v5563_v8 = vld [vmem:[#allocation9_spill] sm:$0xff] }
 0x1ae   : > { %2230 = vmatpush.bf16.msrb.mxu3 %v3493_v56  ;;  %v3476_v56 = vld [vmem:[%s5515_s3 + $0xb0] sm:$0xf] }
 0x1af   : > { %v5124_v12 = vpop.f32.mrf.mxu3 }
 0x1b2   : > { %v1587_v42 = vpop.f32.mrf.mxu2  ;;  %v1648_v57 = vpop.f32.mrf.mxu0 }
 0x1b3   : > { %v1588_v15 = vadd.f32 %v1587_v42, %v1539_v31  ;;  %v1649_v17 = vadd.f32 %v1648_v57, %v1600_v62  ;;  %v1697_v51 = vpop.f32.mrf.mxu1  ;;  %v3430_v31 = vld [vmem:[%s5515_s3 + $0x58] sm:$0xf0]  ;;  %v1610_v57 = vadd.f32 %v5016_v40, %v5067_v38  ;;  %v3762_v40 = vld [vmem:[%s5515_s3 + $0xc4] sm:$0xf0] }
 0x1b4   : > { %v3433_v16 = vor.u32 %v3747_v61, %v3430_v31  ;;  %v3494_v42 = vld [vmem:[%s5515_s3 + $0xd8] sm:$0xf0]  ;;  %v1617_v61 = vadd.f32 %v5055_v46, %v5067_v38  ;;  %v3759_v46 = vld [vmem:[%s5515_s3 + $0xb4] sm:$0xf] }
 0x1b5   : > { %v1963_v5 = vmax.f32 %v1588_v15, 0.0  ;;  %v1698_v1 = vadd.f32 %v1697_v51, %v1649_v17  ;;  %1843 = vmatmul.bf16.vlgmr.msrb.gmra.mxu0 %v5560_v2  ;;  %v3497_v15 = vor.u32 %v3763_v54, %v3494_v42 }
 0x1b6   : > { %3378 = vmatmul.msk.bf16.vlgmr.msrb.gmra.mxu1 %vm1222_vm0, %v5561_v50  ;;  %2279 = vmatpush.bf16.msra.mxu0 %v3433_v16  ;;  %v3484_v50 = vld [vmem:[%s5515_s3 + $0xc0] sm:$0xf]  ;;  %v3743_v16 = vld [vmem:[%s5515_s3 + $0x34] sm:$0xf] }
 0x1b7   : > { %2187 = vmatmul.bf16.vlgmr.msrb.gmra.mxu2 %v4905_v19  ;;  %v5088_v27 = vpack.c.bf16 %v1963_v5, %v1961_v35  ;;  %2328 = vmatpush.bf16.msra.mxu1 %v3497_v15  ;;  %v5144_v2 = vpop.f32.mrf.mxu3 }
 0x1ba   : > { %v1746_v32 = vpop.f32.mrf.mxu2  ;;  %v1650_v28 = vpop.f32.mrf.mxu0 }
 0x1bb   : > { %v5092_v47 = vadd.f32 %v1746_v32, %v1698_v1  ;;  %v1651_v55 = vadd.f32 %v1650_v28, %v1602_v33  ;;  %v1699_v63 = vpop.f32.mrf.mxu1  ;;  %v3485_v33 = vor.u32 %v3762_v40, %v3484_v50  ;;  %v1612_v32 = vadd.f32 %v5031_v25, %v5067_v38  ;;  %v3761_v25 = vld [vmem:[%s5515_s3 + $0xc4] sm:$0xf] }
 0x1bd   : > { %v1700_v10 = vadd.f32 %v1699_v63, %v1651_v55  ;;  %2231 = vmatpush.bf16.msrb.mxu3 %v3485_v33  ;;  %v3745_v55 = vld [vmem:[%s5515_s3 + $0x44] sm:$0xf]  ;;  %v3422_v63 = vld [vmem:[%s5515_s3 + $0x48] sm:$0xf0] }
 0x1be   : > { %v3425_v45 = vor.u32 %v3745_v55, %v3422_v63 }
 0x1c0   : > { %2280 = vmatpush.bf16.msra.mxu0 %v3425_v45 }
 0x1c2   : > { %v1748_v52 = vpop.f32.mrf.mxu2  ;;  %v1653_v11 = vpop.f32.mrf.mxu0 }
 0x1c3   : > { %v5110_v7 = vadd.f32 %v1748_v52, %v1700_v10  ;;  %v1654_v41 = vadd.f32 %v1653_v11, %v1605_v0  ;;  %v1702_v44 = vpop.f32.mrf.mxu1  ;;  %v5172_v0 = vpop.f32.mrf.mxu3  ;;  %v3489_v52 = vor.u32 %v3761_v25, %v3486_v22  ;;  %v1615_v11 = vadd.f32 %v5041_v34, %v5067_v38  ;;  %v3757_v22 = vld [vmem:[%s5515_s3 + $0xa4] sm:$0xf] }
 0x1c5   : > { %v1703_v20 = vadd.f32 %v1702_v44, %v1654_v41  ;;  %1848 = vmatmul.bf16.gmra.mxu0 %v5562_v37  ;;  %2329 = vmatpush.bf16.msra.mxu1 %v3489_v52  ;;  %v3470_v52 = vld [vmem:[%s5515_s3 + $0xa8] sm:$0xf0] }
 0x1c6   : > { %3379 = vmatmul.msk.bf16.gmra.mxu1 %vm1222_vm0, %v5563_v8  ;;  %v5566_v8 = vld [vmem:[#allocation12_spill] sm:$0xff] }
 0x1c7   : > { %2192 = vmatmul.bf16.gmra.mxu2 %v4927_v49 }
 0x1ca   : > { %v1751_v59 = vpop.f32.mrf.mxu2  ;;  %v1655_v4 = vpop.f32.mrf.mxu0 }
 0x1cb   : > { %v5126_v39 = vadd.f32 %v1751_v59, %v1703_v20  ;;  %v1656_v60 = vadd.f32 %v1655_v4, %v1607_v13  ;;  %v1704_v43 = vpop.f32.mrf.mxu1  ;;  %v3760_v13 = vld [vmem:[%s5515_s3 + $0xb4] sm:$0xf0]  ;;  %v5567_v59 = vld [vmem:[#allocation13_spill] sm:$0xff]  ;;  %v5188_v4 = vpop.f32.mrf.mxu3 }
 0x1cc   : > { %v3477_v34 = vor.u32 %v3760_v13, %v3476_v56  ;;  %v3460_v56 = vld [vmem:[%s5515_s3 + $0x90] sm:$0xf]  ;;  %v3756_v13 = vld [vmem:[%s5515_s3 + $0x94] sm:$0xf0] }
 0x1cd   : > { %v1705_v62 = vadd.f32 %v1704_v43, %v1656_v60 }
 0x1ce   : > { %2232 = vmatpush.bf16.msrb.mxu3 %v3477_v34  ;;  %v5571_v34 = vld [vmem:[#allocation17_spill] sm:$0xff] }
 0x1d2   : > { %v1753_v17 = vpop.f32.mrf.mxu2  ;;  %v1658_v35 = vpop.f32.mrf.mxu0 }
 0x1d3   : > { %v5142_v51 = vadd.f32 %v1753_v17, %v1705_v62  ;;  %v1659_v5 = vadd.f32 %v1658_v35, %v1610_v57  ;;  %v1707_v1 = vpop.f32.mrf.mxu1  ;;  %v3414_v62 = vld [vmem:[%s5515_s3 + $0x38] sm:$0xf0] }
 0x1d4   : > { %v3417_v15 = vor.u32 %v3743_v16, %v3414_v62  ;;  %v3478_v17 = vld [vmem:[%s5515_s3 + $0xb8] sm:$0xf0] }
 0x1d5   : > { %v1708_v3 = vadd.f32 %v1707_v1, %v1659_v5  ;;  %1853 = vmatmul.bf16.gmra.mxu0 %v5564_v53  ;;  %v3481_v35 = vor.u32 %v3759_v46, %v3478_v17  ;;  %v1620_v5 = vadd.f32 %v5108_v29, %v5067_v38  ;;  %v3758_v29 = vld [vmem:[%s5515_s3 + $0xa4] sm:$0xf0]  ;;  %v3737_v17 = vld [vmem:[%s5515_s3 + $0x4] sm:$0xf] }
 0x1d6   : > { %3380 = vmatmul.msk.bf16.gmra.mxu1 %vm1222_vm0, %v5565_v26  ;;  %2281 = vmatpush.bf16.msra.mxu0 %v3417_v15 }
 0x1d7   : > { %2197 = vmatmul.bf16.gmra.mxu2 %v4943_v36  ;;  %2330 = vmatpush.bf16.msra.mxu1 %v3481_v35  ;;  %v3390_v35 = vld [vmem:[%s5515_s3 + $0x8] sm:$0xf0] }
 0x1da   : > { %v1756_v28 = vpop.f32.mrf.mxu2  ;;  %v1660_v6 = vpop.f32.mrf.mxu0 }
 0x1db   : > { %v5158_v23 = vadd.f32 %v1756_v28, %v1708_v3  ;;  %v1661_v18 = vadd.f32 %v1660_v6, %v1612_v32  ;;  %v1709_v10 = vpop.f32.mrf.mxu1  ;;  %v5208_v3 = vpop.f32.mrf.mxu3  ;;  %v5568_v32 = vld [vmem:[#allocation14_spill] sm:$0xff]  ;;  %v3468_v28 = vld [vmem:[%s5515_s3 + $0xa0] sm:$0xf]  ;;  %v5569_v6 = vld [vmem:[#allocation15_spill] sm:$0xff] }
 0x1dc   : > { %v3469_v55 = vor.u32 %v3758_v29, %v3468_v28  ;;  %v3452_v28 = vld [vmem:[%s5515_s3 + $0x80] sm:$0xf]  ;;  %v3754_v29 = vld [vmem:[%s5515_s3 + $0x84] sm:$0xf0] }
 0x1dd   : > { %v1710_v21 = vadd.f32 %v1709_v10, %v1661_v18  ;;  %v3741_v18 = vld [vmem:[%s5515_s3 + $0x24] sm:$0xf]  ;;  %v3406_v10 = vld [vmem:[%s5515_s3 + $0x28] sm:$0xf0] }
 0x1de   : > { %2233 = vmatpush.bf16.msrb.mxu3 %v3469_v55 }
 0x1e2   : > { %v1758_v41 = vpop.f32.mrf.mxu2  ;;  %v1663_v20 = vpop.f32.mrf.mxu0 }
 0x1e3   : > { %v5176_v44 = vadd.f32 %v1758_v41, %v1710_v21  ;;  %v1664_v37 = vadd.f32 %v1663_v20, %v1615_v11  ;;  %v1712_v58 = vpop.f32.mrf.mxu1  ;;  %v3409_v21 = vor.u32 %v3741_v18, %v3406_v10  ;;  %v1634_v25 = vpop.f32.mrf.mxu3  ;;  %v3473_v11 = vor.u32 %v3757_v22, %v3470_v52  ;;  %v3454_v22 = vld [vmem:[%s5515_s3 + $0x88] sm:$0xf0] }
 0x1e4   : > { %v1625_v41 = vadd.f32 %v5144_v2, %v5067_v38  ;;  %v3461_v2 = vor.u32 %v3756_v13, %v3460_v56  ;;  %v1635_v52 = vadd.f32 %v1634_v25, %v5067_v38  ;;  %v5574_v56 = vld [vmem:[#allocation21_spill] sm:$0xff]  ;;  %v5575_v13 = vld [vmem:[#allocation22_spill] sm:$0xff] }
 0x1e5   : > { %v1713_v48 = vadd.f32 %v1712_v58, %v1664_v37  ;;  %1858 = vmatmul.bf16.gmra.mxu0 %v5566_v8  ;;  %2331 = vmatpush.bf16.msra.mxu1 %v3473_v11  ;;  %v5570_v8 = vld [vmem:[#allocation16_spill] sm:$0xff] }
 0x1e6   : > { %3381 = vmatmul.msk.bf16.gmra.mxu1 %vm1222_vm0, %v5567_v59  ;;  %2282 = vmatpush.bf16.msra.mxu0 %v3409_v21  ;;  %v3753_v21 = vld [vmem:[%s5515_s3 + $0x84] sm:$0xf] }
 0x1e7   : > { %2202 = vmatmul.bf16.gmra.mxu2 %v4967_v14  ;;  %2234 = vmatpush.bf16.msrb.mxu3 %v3461_v2  ;;  %v3457_v11 = vor.u32 %v3753_v21, %v3454_v22 }
 0x1ea   : > { %v1761_v31 = vpop.f32.mrf.mxu2  ;;  %v1665_v43 = vpop.f32.mrf.mxu0 }
 0x1eb   : > { %v5192_v60 = vadd.f32 %v1761_v31, %v1713_v48  ;;  %v1666_v54 = vadd.f32 %v1665_v43, %v1617_v61  ;;  %v1714_v42 = vpop.f32.mrf.mxu1  ;;  %v5251_v59 = vpop.f32.mrf.mxu3  ;;  %v3739_v31 = vld [vmem:[%s5515_s3 + $0x14] sm:$0xf]  ;;  %v3398_v43 = vld [vmem:[%s5515_s3 + $0x18] sm:$0xf0] }
 0x1ec   : > { %v3401_v62 = vor.u32 %v3739_v31, %v3398_v43 }
 0x1ed   : > { %v1715_v57 = vadd.f32 %v1714_v42, %v1666_v54  ;;  %v3755_v54 = vld [vmem:[%s5515_s3 + $0x94] sm:$0xf]  ;;  %v3462_v42 = vld [vmem:[%s5515_s3 + $0x98] sm:$0xf0] }
 0x1ee   : > { %2283 = vmatpush.bf16.msra.mxu0 %v3401_v62  ;;  %v3465_v15 = vor.u32 %v3755_v54, %v3462_v42  ;;  %v3776_v42 = vld [vmem:[%s5517_s5 + $0x38] sm:$0xff] }
 0x1ef   : > { %2555 = vmatpush.bf16.msra.mxu2 %v3776_v42 }
 0x1f0   : > { %2332 = vmatpush.bf16.msra.mxu1 %v3465_v15  ;;  %v3784_v15 = vld [vmem:[%s5517_s5 + $0x78] sm:$0xff] }
 0x1f2   : > { %v1763_v1 = vpop.f32.mrf.mxu2  ;;  %v1668_v50 = vpop.f32.mrf.mxu0 }
 0x1f3   : > { %v5210_v53 = vadd.f32 %v1763_v1, %v1715_v57  ;;  %v1669_v40 = vadd.f32 %v1668_v50, %v1620_v5  ;;  %v1717_v26 = vpop.f32.mrf.mxu1  ;;  %v1630_v57 = vadd.f32 %v5188_v4, %v5067_v38  ;;  %v1795_v46 = vpop.f32.mrf.mxu3  ;;  %v3393_v5 = vor.u32 %v3737_v17, %v3390_v35  ;;  %v5573_v4 = vld [vmem:[#allocation19_spill] sm:$0xff] }
 0x1f4   : > { %2333 = vmatpush.bf16.msra.mxu1 %v3457_v11  ;;  %v1796_v62 = vadd.f32 %v1795_v46, %v5092_v47 }
 0x1f5   : > { %v5212_v33 = vadd.f32 %v1717_v26, %v1669_v40  ;;  %1863 = vmatmul.bf16.gmra.mxu0 %v5568_v32  ;;  %v5572_v32 = vld [vmem:[#allocation18_spill] sm:$0xff] }
 0x1f6   : > { %3382 = vmatmul.msk.bf16.gmra.mxu1 %vm1222_vm0, %v5569_v6  ;;  %2284 = vmatpush.bf16.msra.mxu0 %v3393_v5  ;;  %v3453_v6 = vor.u32 %v3754_v29, %v3452_v28 }
 0x1f7   : > { %2207 = vmatmul.bf16.gmra.mxu2 %v5007_v9 }
 0x1f8   : > { %2235 = vmatpush.bf16.msrb.mxu3 %v3453_v6  ;;  %v3775_v6 = vld [vmem:[%s5517_s5 + $0x30] sm:$0xff] }
 0x1f9   : > { %2556 = vmatpush.bf16.msra.mxu2 %v3775_v6 }
 0x1fa   : > { %v5224_v63 = vpop.f32.mrf.mxu0 }
 0x1fb   : > { %v5232_v45 = vpop.f32.mrf.mxu1  ;;  %v1797_v55 = vpop.f32.mrf.mxu3 }
 0x1fc   : > { %v1798_v17 = vadd.f32 %v1797_v55, %v5110_v7  ;;  %2604 = vmatpush.bf16.msra.mxu3 %v3784_v15  ;;  %v3783_v55 = vld [vmem:[%s5517_s5 + $0x70] sm:$0xff] }
 0x200   : > { %2605 = vmatpush.bf16.msra.mxu3 %v3783_v55 }
 0x202   : > { %v1673_v20 = vpop.f32.mrf.mxu0 }
 0x203   : > { %v1674_v37 = vadd.f32 %v1673_v20, %v1625_v41  ;;  %v1722_v58 = vpop.f32.mrf.mxu1 }
 0x205   : > { %v5242_v48 = vadd.f32 %v1722_v58, %v1674_v37  ;;  %1868 = vmatmul.bf16.gmra.mxu0 %v5570_v8  ;;  %v1800_v58 = vpop.f32.mrf.mxu3 }
 0x206   : > { %3383 = vmatmul.msk.bf16.gmra.mxu1 %vm1222_vm0, %v5571_v34  ;;  %v1801_v29 = vadd.f32 %v1800_v58, %v5126_v39 }
 0x207   : > { %2212 = vmatmul.bf16.gmra.mxu2 %v5037_v24 }
 0x20a   : > { %v5256_v61 = vpop.f32.mrf.mxu0 }
 0x20b   : > { %v5264_v16 = vpop.f32.mrf.mxu1 }
 0x20d   : > { %v1802_v25 = vpop.f32.mrf.mxu3 }
 0x20e   : > { %v1803_v21 = vadd.f32 %v1802_v25, %v5142_v51 }
 0x212   : > { %v1678_v1 = vpop.f32.mrf.mxu0 }
 0x213   : > { %v1679_v50 = vadd.f32 %v1678_v1, %v1630_v57  ;;  %v1727_v40 = vpop.f32.mrf.mxu1 }
 0x215   : > { %v5280_v26 = vadd.f32 %v1727_v40, %v1679_v50  ;;  %1873 = vmatmul.bf16.gmra.mxu0 %v5572_v32  ;;  %v1805_v57 = vpop.f32.mrf.mxu3 }
 0x216   : > { %3384 = vmatmul.msk.bf16.gmra.mxu1 %vm1222_vm0, %v5573_v4 }
 0x217   : > { %2217 = vmatmul.bf16.gmra.mxu2 %v5053_v30 }
 0x21a   : > { %v5292_v18 = vpop.f32.mrf.mxu0 }
 0x21b   : > { %v5294_v10 = vpop.f32.mrf.mxu1 }
 0x21d   : > { %v1807_v32 = vpop.f32.mrf.mxu3 }
 0x21e   : > { %v1808_v42 = vadd.f32 %v1807_v32, %v5176_v44  ;;  %v3773_v32 = vld [vmem:[%s5517_s5 + $0x20] sm:$0xff] }
 0x222   : > { %v1683_v41 = vpop.f32.mrf.mxu0 }
 0x223   : > { %v1684_v20 = vadd.f32 %v1683_v41, %v1635_v52  ;;  %v1732_v37 = vpop.f32.mrf.mxu1 }
 0x225   : > { %v5303_v8 = vadd.f32 %v1732_v37, %v1684_v20  ;;  %1878 = vmatmul.bf16.gmra.mxu0 %v5574_v56  ;;  %v1810_v39 = vpop.f32.mrf.mxu3 }
 0x226   : > { %3385 = vmatmul.msk.bf16.gmra.mxu1 %vm1222_vm0, %v5575_v13 }
 0x227   : > { %2222 = vmatmul.bf16.gmra.mxu2 %v5088_v27 }
 0x22a   : > { %v5309_v34 = vpop.f32.mrf.mxu0 }
 0x22b   : > { %v5311_v2 = vpop.f32.mrf.mxu1 }
 0x22d   : > { %v1812_v51 = vpop.f32.mrf.mxu3 }
 0x232   : > { %v1844_v31 = vpop.f32.mrf.mxu0 }
 0x233   : > { %v1893_v43 = vpop.f32.mrf.mxu1  ;;  %v1845_v54 = vadd.f32 %v1844_v31, %v1796_v62  ;;  %v1766_v31 = vpop.f32.mrf.mxu2  ;;  %v3774_v62 = vld [vmem:[%s5517_s5 + $0x28] sm:$0xff] }
 0x234   : > { %2557 = vmatpush.bf16.msra.mxu2 %v3774_v62 }
 0x235   : > { %2285 = vmatmul.bf16.vlgmr.msra.gmra.mxu0 %v4905_v19  ;;  %v1894_v5 = vadd.f32 %v1893_v43, %v1845_v54  ;;  %v1806_v43 = vadd.f32 %v1805_v57, %v5158_v23  ;;  %v3782_v54 = vld [vmem:[%s5517_s5 + $0x68] sm:$0xff] }
 0x236   : > { %2606 = vmatpush.bf16.msra.mxu3 %v3782_v54 }
 0x237   : > { %v1934_v19 = vmax.f32 %v1894_v5, 0.0 }
 0x238   : > { %2558 = vmatpush.bf16.msra.mxu2 %v3773_v32 }
 0x23a   : > { %v1846_v35 = vpop.f32.mrf.mxu0 }
 0x23b   : > { %v1847_v1 = vadd.f32 %v1846_v35, %v1798_v17  ;;  %v1895_v47 = vpop.f32.mrf.mxu1 }
 0x23d   : > { %v1896_v46 = vadd.f32 %v1895_v47, %v1847_v1  ;;  %v1815_v47 = vpop.f32.mrf.mxu3 }
 0x23f   : > { %v1936_v50 = vmax.f32 %v1896_v46, 0.0 }
 0x241   : > { %v1966_v40 = vpack.c.bf16 %v1936_v50, %v1934_v19 }
 0x242   : > { %v1849_v4 = vpop.f32.mrf.mxu0 }
 0x243   : > { %v1898_v28 = vpop.f32.mrf.mxu1  ;;  %2236 = vmatmul.bf16.vlgmr.msrb.gmra.mxu3 %v1966_v40  ;;  %2334 = vmatmul.bf16.vlgmr.msra.gmra.mxu1 %v1966_v40  ;;  %v1850_v7 = vadd.f32 %v1849_v4, %v1801_v29  ;;  %v1811_v40 = vadd.f32 %v1810_v39, %v5192_v60  ;;  %v3781_v4 = vld [vmem:[%s5517_s5 + $0x60] sm:$0xff]  ;;  %v1813_v29 = vadd.f32 %v1812_v51, %v5210_v53 }
 0x244   : > { %2607 = vmatpush.bf16.msra.mxu3 %v3781_v4  ;;  %v1767_v39 = vadd.f32 %v1766_v31, %v5212_v33  ;;  %v3780_v33 = vld [vmem:[%s5517_s5 + $0x58] sm:$0xff] }
 0x245   : > { %2290 = vmatmul.bf16.gmra.mxu0 %v4927_v49  ;;  %v1899_v52 = vadd.f32 %v1898_v28, %v1850_v7  ;;  %v1817_v7 = vpop.f32.mrf.mxu3 }
 0x247   : > { %v1938_v49 = vmax.f32 %v1899_v52, 0.0 }
 0x248   : > { %2608 = vmatpush.bf16.msra.mxu3 %v3780_v33 }
 0x24a   : > { %v1851_v22 = vpop.f32.mrf.mxu0 }
 0x24b   : > { %v1852_v11 = vadd.f32 %v1851_v22, %v1803_v21  ;;  %v1900_v41 = vpop.f32.mrf.mxu1 }
 0x24d   : > { %v1901_v20 = vadd.f32 %v1900_v41, %v1852_v11 }
 0x24f   : > { %v1940_v37 = vmax.f32 %v1901_v20, 0.0 }
 0x251   : > { %v1968_v58 = vpack.c.bf16 %v1940_v37, %v1938_v49 }
 0x252   : > { %v1854_v56 = vpop.f32.mrf.mxu0 }
 0x253   : > { %v1903_v13 = vpop.f32.mrf.mxu1  ;;  %2241 = vmatmul.bf16.gmra.mxu3 %v1968_v58  ;;  %2339 = vmatmul.bf16.gmra.mxu1 %v1968_v58  ;;  %v1855_v25 = vadd.f32 %v1854_v56, %v1806_v43  ;;  %v1820_v56 = vpop.f32.mrf.mxu3 }
 0x255   : > { %2295 = vmatmul.bf16.gmra.mxu0 %v4943_v36  ;;  %v1904_v17 = vadd.f32 %v1903_v13, %v1855_v25  ;;  %v1768_v36 = vpop.f32.mrf.mxu2  ;;  %v1816_v13 = vadd.f32 %v1815_v47, %v1767_v39 }
 0x257   : > { %v1942_v5 = vmax.f32 %v1904_v17, 0.0 }
 0x25a   : > { %v1856_v15 = vpop.f32.mrf.mxu0 }
 0x25b   : > { %v1857_v35 = vadd.f32 %v1856_v15, %v1808_v42  ;;  %v1905_v23 = vpop.f32.mrf.mxu1  ;;  %v1822_v15 = vpop.f32.mrf.mxu3 }
 0x25d   : > { %v1906_v57 = vadd.f32 %v1905_v23, %v1857_v35  ;;  %v1771_v28 = vpop.f32.mrf.mxu2 }
 0x25f   : > { %v1944_v1 = vmax.f32 %v1906_v57, 0.0  ;;  %v1772_v57 = vadd.f32 %v1771_v28, %v5242_v48  ;;  %v3779_v48 = vld [vmem:[%s5517_s5 + $0x50] sm:$0xff] }
 0x260   : > { %2609 = vmatpush.bf16.msra.mxu3 %v3779_v48 }
 0x261   : > { %v1970_v46 = vpack.c.bf16 %v1944_v1, %v1942_v5 }
 0x262   : > { %v1859_v19 = vpop.f32.mrf.mxu0 }
 0x263   : > { %v1908_v50 = vpop.f32.mrf.mxu1  ;;  %2246 = vmatmul.bf16.gmra.mxu3 %v1970_v46  ;;  %2344 = vmatmul.bf16.gmra.mxu1 %v1970_v46  ;;  %v1860_v44 = vadd.f32 %v1859_v19, %v1811_v40  ;;  %v1821_v46 = vadd.f32 %v1820_v56, %v1772_v57  ;;  %v1825_v40 = vpop.f32.mrf.mxu3 }
 0x265   : > { %2300 = vmatmul.bf16.gmra.mxu0 %v4967_v14  ;;  %v1909_v55 = vadd.f32 %v1908_v50, %v1860_v44  ;;  %v1622_v14 = vadd.f32 %v5124_v12, %v5067_v38  ;;  %v1773_v49 = vpop.f32.mrf.mxu2 }
 0x267   : > { %v1671_v52 = vadd.f32 %v5224_v63, %v1622_v14  ;;  %v1946_v11 = vmax.f32 %v1909_v55, 0.0  ;;  %v3772_v63 = vld [vmem:[%s5517_s5 + $0x18] sm:$0xff] }
 0x268   : > { %2559 = vmatpush.bf16.msra.mxu2 %v3772_v63 }
 0x269   : > { %v1720_v37 = vadd.f32 %v5232_v45, %v1671_v52 }
 0x26a   : > { %v1861_v6 = vpop.f32.mrf.mxu0 }
 0x26b   : > { %v1862_v60 = vadd.f32 %v1861_v6, %v1813_v29  ;;  %v1910_v21 = vpop.f32.mrf.mxu1  ;;  %v1769_v43 = vadd.f32 %v1768_v36, %v1720_v37 }
 0x26d   : > { %v1911_v22 = vadd.f32 %v1910_v21, %v1862_v60  ;;  %v1818_v31 = vadd.f32 %v1817_v7, %v1769_v43  ;;  %v1776_v54 = vpop.f32.mrf.mxu2  ;;  %v1637_v43 = vadd.f32 %v5251_v59, %v5067_v38 }
 0x26e   : > { %v1777_v21 = vadd.f32 %v1776_v54, %v5280_v26  ;;  %v3769_v54 = vld [vmem:[%s5517_s5] sm:$0xff] }
 0x26f   : > { %v1948_v41 = vmax.f32 %v1911_v22, 0.0  ;;  %v1827_v22 = vpop.f32.mrf.mxu3  ;;  %v1686_v63 = vadd.f32 %v5309_v34, %v1637_v43 }
 0x270   : > { %v1826_v39 = vadd.f32 %v1825_v40, %v1777_v21 }
 0x271   : > { %v1972_v20 = vpack.c.bf16 %v1948_v41, %v1946_v11 }
 0x272   : > { %v1864_v53 = vpop.f32.mrf.mxu0 }
 0x273   : > { %v1913_v58 = vpop.f32.mrf.mxu1  ;;  %2251 = vmatmul.bf16.gmra.mxu3 %v1972_v20  ;;  %2349 = vmatmul.bf16.gmra.mxu1 %v1972_v20  ;;  %v1865_v12 = vadd.f32 %v1864_v53, %v1816_v13 }
 0x275   : > { %2305 = vmatmul.bf16.gmra.mxu0 %v5007_v9  ;;  %v1914_v51 = vadd.f32 %v1913_v58, %v1865_v12  ;;  %v1627_v9 = vadd.f32 %v5172_v0, %v5067_v38  ;;  %v1778_v0 = vpop.f32.mrf.mxu2 }
 0x277   : > { %v1676_v17 = vadd.f32 %v5256_v61, %v1627_v9  ;;  %v1950_v35 = vmax.f32 %v1914_v51, 0.0  ;;  %v3771_v61 = vld [vmem:[%s5517_s5 + $0x10] sm:$0xff]  ;;  %v1830_v13 = vpop.f32.mrf.mxu3 }
 0x278   : > { %2560 = vmatpush.bf16.msra.mxu2 %v3771_v61 }
 0x279   : > { %v1725_v1 = vadd.f32 %v5264_v16, %v1676_v17 }
 0x27a   : > { %v1866_v45 = vpop.f32.mrf.mxu0 }
 0x27b   : > { %v1867_v25 = vadd.f32 %v1866_v45, %v1818_v31  ;;  %v1915_v62 = vpop.f32.mrf.mxu1  ;;  %v1774_v19 = vadd.f32 %v1773_v49, %v1725_v1 }
 0x27d   : > { %v1916_v42 = vadd.f32 %v1915_v62, %v1867_v25  ;;  %v1823_v44 = vadd.f32 %v1822_v15, %v1774_v19  ;;  %v1781_v60 = vpop.f32.mrf.mxu2  ;;  %v1735_v25 = vadd.f32 %v5311_v2, %v1686_v63  ;;  %v3777_v2 = vld [vmem:[%s5517_s5 + $0x40] sm:$0xff] }
 0x27f   : > { %v1952_v23 = vmax.f32 %v1916_v42, 0.0  ;;  %v1832_v34 = vpop.f32.mrf.mxu3 }
 0x281   : > { %v1974_v36 = vpack.c.bf16 %v1952_v23, %v1950_v35 }
 0x282   : > { %v1869_v5 = vpop.f32.mrf.mxu0 }
 0x283   : > { %v1918_v47 = vpop.f32.mrf.mxu1  ;;  %2256 = vmatmul.bf16.gmra.mxu3 %v1974_v36  ;;  %2354 = vmatmul.bf16.gmra.mxu1 %v1974_v36  ;;  %v1870_v50 = vadd.f32 %v1869_v5, %v1821_v46 }
 0x285   : > { %2310 = vmatmul.bf16.gmra.mxu0 %v5037_v24  ;;  %v1919_v32 = vadd.f32 %v1918_v47, %v1870_v50  ;;  %v1632_v24 = vadd.f32 %v5208_v3, %v5067_v38  ;;  %v3770_v3 = vld [vmem:[%s5517_s5 + $0x8] sm:$0xff] }
 0x286   : > { %2561 = vmatpush.bf16.msra.mxu2 %v3770_v3 }
 0x287   : > { %v1681_v7 = vadd.f32 %v5292_v18, %v1632_v24  ;;  %v1954_v6 = vmax.f32 %v1919_v32, 0.0  ;;  %v3778_v18 = vld [vmem:[%s5517_s5 + $0x48] sm:$0xff] }
 0x288   : > { %2610 = vmatpush.bf16.msra.mxu3 %v3778_v18 }
 0x289   : > { %v1730_v11 = vadd.f32 %v5294_v10, %v1681_v7  ;;  %v1783_v10 = vpop.f32.mrf.mxu2 }
 0x28a   : > { %v1871_v16 = vpop.f32.mrf.mxu0  ;;  %v1784_v59 = vadd.f32 %v1783_v10, %v1735_v25  ;;  %2562 = vmatpush.bf16.msra.mxu2 %v3769_v54 }
 0x28b   : > { %v1872_v4 = vadd.f32 %v1871_v16, %v1823_v44  ;;  %v1920_v28 = vpop.f32.mrf.mxu1  ;;  %v1779_v20 = vadd.f32 %v1778_v0, %v1730_v11  ;;  %v2013_v0 = vld [vmem:[%s5516_s4] sm:$0x3] }
 0x28c   : > { %2611 = vmatpush.bf16.msra.mxu3 %v3777_v2  ;;  %v5400_v61 = vperm.slane %v2013_v0, 1  ;;  %v5403_v32 = vperm.slane %v2013_v0, 0 }
 0x28d   : > { %v1921_v29 = vadd.f32 %v1920_v28, %v1872_v4  ;;  %v1828_v49 = vadd.f32 %v1827_v22, %v1779_v20 }
 0x28f   : > { %v1956_v55 = vmax.f32 %v1921_v29, 0.0 }
 0x291   : > { %v1976_v14 = vpack.c.bf16 %v1956_v55, %v1954_v6  ;;  %v2188_v9 = vpop.f32.mrf.mxu2 }
 0x292   : > { %v1874_v52 = vpop.f32.mrf.mxu0  ;;  %v2189_v6 = vadd.f32 %v2188_v9, %v5403_v32 }
 0x293   : > { %v1923_v41 = vpop.f32.mrf.mxu1  ;;  %2261 = vmatmul.bf16.gmra.mxu3 %v1976_v14  ;;  %2359 = vmatmul.bf16.gmra.mxu1 %v1976_v14  ;;  %v1875_v26 = vadd.f32 %v1874_v52, %v1826_v39 }
 0x295   : > { %2315 = vmatmul.bf16.gmra.mxu0 %v5053_v30  ;;  %v1924_v37 = vadd.f32 %v1923_v41, %v1875_v26  ;;  %v1782_v30 = vadd.f32 %v1781_v60, %v5303_v8  ;;  %v1833_v8 = vadd.f32 %v1832_v34, %v1784_v59 }
 0x297   : > { %v1958_v33 = vmax.f32 %v1924_v37, 0.0  ;;  %v1831_v38 = vadd.f32 %v1830_v13, %v1782_v30 }
 0x299   : > { %v2190_v36 = vpop.f32.mrf.mxu2 }
 0x29a   : > { %v1876_v53 = vpop.f32.mrf.mxu0  ;;  %v2191_v14 = vadd.f32 %v2190_v36, %v5403_v32 }
 0x29b   : > { %v1877_v58 = vadd.f32 %v1876_v53, %v1828_v49  ;;  %v1925_v56 = vpop.f32.mrf.mxu1 }
 0x29d   : > { %v1926_v12 = vadd.f32 %v1925_v56, %v1877_v58 }
 0x29f   : > { %v1960_v31 = vmax.f32 %v1926_v12, 0.0 }
 0x2a1   : > { %v1978_v45 = vpack.c.bf16 %v1960_v31, %v1958_v33 }
 0x2a2   : > { %v1879_v51 = vpop.f32.mrf.mxu0 }
 0x2a3   : > { %v1928_v62 = vpop.f32.mrf.mxu1  ;;  %2266 = vmatmul.bf16.gmra.mxu3 %v1978_v45  ;;  %2364 = vmatmul.bf16.gmra.mxu1 %v1978_v45  ;;  %v1880_v42 = vadd.f32 %v1879_v51, %v1831_v38 }
 0x2a5   : > { %2320 = vmatmul.bf16.gmra.mxu0 %v5088_v27  ;;  %v1929_v17 = vadd.f32 %v1928_v62, %v1880_v42  ;;  %v2193_v27 = vpop.f32.mrf.mxu2 }
 0x2a6   : > { %v2194_v12 = vadd.f32 %v2193_v27, %v5403_v32 }
 0x2a7   : > { %v1962_v5 = vmax.f32 %v1929_v17, 0.0 }
 0x2aa   : > { %v1881_v15 = vpop.f32.mrf.mxu0 }
 0x2ab   : > { %v1882_v35 = vadd.f32 %v1881_v15, %v1833_v8  ;;  %v1930_v23 = vpop.f32.mrf.mxu1 }
 0x2ad   : > { %v1931_v57 = vadd.f32 %v1930_v23, %v1882_v35  ;;  %v2195_v48 = vpop.f32.mrf.mxu2 }
 0x2ae   : > { %v2196_v31 = vadd.f32 %v2195_v48, %v5403_v32 }
 0x2af   : > { %v1964_v1 = vmax.f32 %v1931_v57, 0.0 }
 0x2b1   : > { %v1980_v47 = vpack.c.bf16 %v1964_v1, %v1962_v5 }
 0x2b2   : > { %v2286_v46 = vpop.f32.mrf.mxu0 }
 0x2b3   : > { %2271 = vmatmul.bf16.gmra.mxu3 %v1980_v47  ;;  %2369 = vmatmul.bf16.gmra.mxu1 %v1980_v47  ;;  %v2287_v44 = vadd.f32 %v2286_v46, %v5400_v61 }
 0x2b5   : > { %v2198_v21 = vpop.f32.mrf.mxu2 }
 0x2b6   : > { %v2199_v36 = vadd.f32 %v2198_v21, %v5403_v32 }
 0x2ba   : > { %v2288_v19 = vpop.f32.mrf.mxu0 }
 0x2bb   : > { %v2289_v4 = vadd.f32 %v2288_v19, %v5400_v61 }
 0x2bd   : > { %v2200_v10 = vpop.f32.mrf.mxu2 }
 0x2be   : > { %v2201_v47 = vadd.f32 %v2200_v10, %v5403_v32 }
 0x2c0   : > { %v2335_v50 = vpop.f32.mrf.mxu1 }
 0x2c1   : > { %v2336_v28 = vadd.f32 %v2335_v50, %v2287_v44 }
 0x2c2   : > { %v2291_v40 = vpop.f32.mrf.mxu0 }
 0x2c3   : > { %v2376_v55 = vmax.f32 %v2336_v28, 0.0  ;;  %v2292_v49 = vadd.f32 %v2291_v40, %v5400_v61 }
 0x2c5   : > { %v2203_v62 = vpop.f32.mrf.mxu2 }
 0x2c6   : > { %v2237_v16 = vpop.f32.mrf.mxu3  ;;  %v2204_v21 = vadd.f32 %v2203_v62, %v5403_v32 }
 0x2c7   : > { %v2238_v22 = vadd.f32 %v2237_v16, %v2189_v6 }
 0x2c8   : > { %v2337_v24 = vpop.f32.mrf.mxu1 }
 0x2c9   : > { %v2338_v29 = vadd.f32 %v2337_v24, %v2289_v4  ;;  %v2375_v18 = vmax.f32 %v2238_v22, 0.0 }
 0x2ca   : > { %v2293_v7 = vpop.f32.mrf.mxu0 }
 0x2cb   : > { %v2378_v60 = vmax.f32 %v2338_v29, 0.0  ;;  %v2294_v37 = vadd.f32 %v2293_v7, %v5400_v61 }
 0x2cd   : > { %v2408_v52 = vpack.c.bf16 %v2378_v60, %v2376_v55  ;;  %v2205_v23 = vpop.f32.mrf.mxu2 }
 0x2ce   : > { %v2239_v11 = vpop.f32.mrf.mxu3 }
 0x2cf   : > { %v2240_v41 = vadd.f32 %v2239_v11, %v2191_v14  ;;  %2612 = vmatmul.bf16.vlgmr.msra.gmra.mxu3 %v2408_v52  ;;  %v2206_v52 = vadd.f32 %v2205_v23, %v5403_v32 }
 0x2d0   : > { %v2340_v3 = vpop.f32.mrf.mxu1 }
 0x2d1   : > { %v2377_v39 = vmax.f32 %v2240_v41, 0.0  ;;  %v2341_v58 = vadd.f32 %v2340_v3, %v2292_v49 }
 0x2d2   : > { %v2296_v20 = vpop.f32.mrf.mxu0 }
 0x2d3   : > { %v2407_v26 = vpack.c.bf16 %v2377_v39, %v2375_v18  ;;  %v2380_v63 = vmax.f32 %v2341_v58, 0.0  ;;  %v2297_v42 = vadd.f32 %v2296_v20, %v5400_v61 }
 0x2d5   : > { %2563 = vmatmul.bf16.vlgmr.msra.gmra.mxu2 %v2407_v26  ;;  %v2208_v4 = vpop.f32.mrf.mxu2 }
 0x2d6   : > { %v2242_v53 = vpop.f32.mrf.mxu3 }
 0x2d7   : > { %v2243_v30 = vadd.f32 %v2242_v53, %v2194_v12 }
 0x2d8   : > { %v2342_v56 = vpop.f32.mrf.mxu1 }
 0x2d9   : > { %v2343_v13 = vadd.f32 %v2342_v56, %v2294_v37  ;;  %v2379_v9 = vmax.f32 %v2243_v30, 0.0 }
 0x2da   : > { %v2298_v43 = vpop.f32.mrf.mxu0 }
 0x2db   : > { %v2382_v33 = vmax.f32 %v2343_v13, 0.0  ;;  %v2299_v2 = vadd.f32 %v2298_v43, %v5400_v61 }
 0x2dd   : > { %v2410_v45 = vpack.c.bf16 %v2382_v33, %v2380_v63  ;;  %v2210_v3 = vpop.f32.mrf.mxu2  ;;  %v2209_v33 = vadd.f32 %v2208_v4, %v5403_v32 }
 0x2de   : > { %v2244_v51 = vpop.f32.mrf.mxu3 }
 0x2df   : > { %v2245_v25 = vadd.f32 %v2244_v51, %v2196_v31  ;;  %2617 = vmatmul.bf16.gmra.mxu3 %v2410_v45  ;;  %v2211_v51 = vadd.f32 %v2210_v3, %v5403_v32 }
 0x2e0   : > { %v2345_v54 = vpop.f32.mrf.mxu1 }
 0x2e1   : > { %v2381_v38 = vmax.f32 %v2245_v25, 0.0  ;;  %v2346_v15 = vadd.f32 %v2345_v54, %v2297_v42 }
 0x2e2   : > { %v2301_v59 = vpop.f32.mrf.mxu0 }
 0x2e3   : > { %v2409_v34 = vpack.c.bf16 %v2381_v38, %v2379_v9  ;;  %v2384_v5 = vmax.f32 %v2346_v15, 0.0  ;;  %v2302_v28 = vadd.f32 %v2301_v59, %v5400_v61 }
 0x2e5   : > { %2568 = vmatmul.bf16.gmra.mxu2 %v2409_v34  ;;  %v2213_v43 = vpop.f32.mrf.mxu2 }
 0x2e6   : > { %v2247_v8 = vpop.f32.mrf.mxu3 }
 0x2e7   : > { %v2248_v46 = vadd.f32 %v2247_v8, %v2199_v36 }
 0x2e8   : > { %v2347_v17 = vpop.f32.mrf.mxu1 }
 0x2e9   : > { %v2348_v35 = vadd.f32 %v2347_v17, %v2299_v2  ;;  %v2383_v48 = vmax.f32 %v2248_v46, 0.0 }
 0x2ea   : > { %v2303_v57 = vpop.f32.mrf.mxu0 }
 0x2eb   : > { %v2386_v1 = vmax.f32 %v2348_v35, 0.0  ;;  %v2304_v29 = vadd.f32 %v2303_v57, %v5400_v61 }
 0x2ed   : > { %v2412_v27 = vpack.c.bf16 %v2386_v1, %v2384_v5  ;;  %v2215_v42 = vpop.f32.mrf.mxu2  ;;  %v2214_v5 = vadd.f32 %v2213_v43, %v5403_v32 }
 0x2ee   : > { %v2249_v19 = vpop.f32.mrf.mxu3 }
 0x2ef   : > { %v2250_v0 = vadd.f32 %v2249_v19, %v2201_v47  ;;  %2622 = vmatmul.bf16.gmra.mxu3 %v2412_v27  ;;  %v2216_v27 = vadd.f32 %v2215_v42, %v5403_v32 }
 0x2f0   : > { %v2350_v50 = vpop.f32.mrf.mxu1 }
 0x2f1   : > { %v2385_v40 = vmax.f32 %v2250_v0, 0.0  ;;  %v2351_v7 = vadd.f32 %v2350_v50, %v2302_v28 }
 0x2f2   : > { %v2306_v44 = vpop.f32.mrf.mxu0 }
 0x2f3   : > { %v2411_v16 = vpack.c.bf16 %v2385_v40, %v2383_v48  ;;  %v2388_v14 = vmax.f32 %v2351_v7, 0.0  ;;  %v2307_v37 = vadd.f32 %v2306_v44, %v5400_v61 }
 0x2f5   : > { %2573 = vmatmul.bf16.gmra.mxu2 %v2411_v16  ;;  %v2218_v46 = vpop.f32.mrf.mxu2 }
 0x2f6   : > { %v2252_v24 = vpop.f32.mrf.mxu3 }
 0x2f7   : > { %v2253_v11 = vadd.f32 %v2252_v24, %v2204_v21 }
 0x2f8   : > { %v2352_v6 = vpop.f32.mrf.mxu1 }
 0x2f9   : > { %v2353_v55 = vadd.f32 %v2352_v6, %v2304_v29  ;;  %v2387_v26 = vmax.f32 %v2253_v11, 0.0 }
 0x2fa   : > { %v2308_v60 = vpop.f32.mrf.mxu0 }
 0x2fb   : > { %v2390_v22 = vmax.f32 %v2353_v55, 0.0  ;;  %v2309_v56 = vadd.f32 %v2308_v60, %v5400_v61 }
 0x2fd   : > { %v2414_v41 = vpack.c.bf16 %v2390_v22, %v2388_v14  ;;  %v2220_v29 = vpop.f32.mrf.mxu2  ;;  %v2219_v22 = vadd.f32 %v2218_v46, %v5403_v32 }
 0x2fe   : > { %v2254_v18 = vpop.f32.mrf.mxu3 }
 0x2ff   : > { %v2255_v39 = vadd.f32 %v2254_v18, %v2206_v52  ;;  %2627 = vmatmul.bf16.gmra.mxu3 %v2414_v41  ;;  %v2221_v41 = vadd.f32 %v2220_v29, %v5403_v32 }
 0x300   : > { %v2355_v20 = vpop.f32.mrf.mxu1 }
 0x301   : > { %v2389_v49 = vmax.f32 %v2255_v39, 0.0  ;;  %v2356_v13 = vadd.f32 %v2355_v20, %v2307_v37 }
 0x302   : > { %v2311_v10 = vpop.f32.mrf.mxu0 }
 0x303   : > { %v2413_v53 = vpack.c.bf16 %v2389_v49, %v2387_v26  ;;  %v2392_v31 = vmax.f32 %v2356_v13, 0.0  ;;  %v2312_v2 = vadd.f32 %v2311_v10, %v5400_v61 }
 0x305   : > { %2578 = vmatmul.bf16.gmra.mxu2 %v2413_v53  ;;  %v2223_v26 = vpop.f32.mrf.mxu2 }
 0x306   : > { %v2257_v58 = vpop.f32.mrf.mxu3 }
 0x307   : > { %v2258_v25 = vadd.f32 %v2257_v58, %v2209_v33 }
 0x308   : > { %v2357_v12 = vpop.f32.mrf.mxu1 }
 0x309   : > { %v2358_v63 = vadd.f32 %v2357_v12, %v2309_v56  ;;  %v2391_v59 = vmax.f32 %v2258_v25, 0.0 }
 0x30a   : > { %v2313_v45 = vpop.f32.mrf.mxu0 }
 0x30b   : > { %v2394_v30 = vmax.f32 %v2358_v63, 0.0  ;;  %v2314_v35 = vadd.f32 %v2313_v45, %v5400_v61 }
 0x30d   : > { %v2416_v62 = vpack.c.bf16 %v2394_v30, %v2392_v31  ;;  %v2225_v31 = vpop.f32.mrf.mxu2  ;;  %v2224_v30 = vadd.f32 %v2223_v26, %v5403_v32 }
 0x30e   : > { %v2259_v54 = vpop.f32.mrf.mxu3  ;;  %v2226_v25 = vadd.f32 %v2225_v31, %v5403_v32 }
 0x30f   : > { %v2260_v9 = vadd.f32 %v2259_v54, %v2211_v51  ;;  %2632 = vmatmul.bf16.gmra.mxu3 %v2416_v62 }
 0x310   : > { %v2360_v38 = vpop.f32.mrf.mxu1 }
 0x311   : > { %v2393_v34 = vmax.f32 %v2260_v9, 0.0  ;;  %v2361_v23 = vadd.f32 %v2360_v38, %v2312_v2 }
 0x312   : > { %v2316_v15 = vpop.f32.mrf.mxu0 }
 0x313   : > { %v2415_v8 = vpack.c.bf16 %v2393_v34, %v2391_v59  ;;  %v2396_v1 = vmax.f32 %v2361_v23, 0.0  ;;  %v2317_v24 = vadd.f32 %v2316_v15, %v5400_v61 }
 0x315   : > { %2583 = vmatmul.bf16.gmra.mxu2 %v2415_v8  ;;  %v5440_v8 = vld [vmem:[%s5518_s6] ss:$0 sm:$0xff] }
 0x316   : > { %v2262_v17 = vpop.f32.mrf.mxu3 }
 0x317   : > { %v2263_v19 = vadd.f32 %v2262_v17, %v2214_v5 }
 0x318   : > { %v2362_v57 = vpop.f32.mrf.mxu1 }
 0x319   : > { %v2363_v36 = vadd.f32 %v2362_v57, %v2314_v35  ;;  %v2395_v16 = vmax.f32 %v2263_v19, 0.0 }
 0x31a   : > { %v2318_v40 = vpop.f32.mrf.mxu0 }
 0x31b   : > { %v2398_v47 = vmax.f32 %v2363_v36, 0.0  ;;  %v2319_v6 = vadd.f32 %v2318_v40, %v5400_v61 }
 0x31d   : > { %v2418_v0 = vpack.c.bf16 %v2398_v47, %v2396_v1 }
 0x31e   : > { %v2264_v50 = vpop.f32.mrf.mxu3 }
 0x31f   : > { %v2265_v48 = vadd.f32 %v2264_v50, %v2216_v27  ;;  %2637 = vmatmul.bf16.gmra.mxu3 %v2418_v0 }
 0x320   : > { %v2365_v44 = vpop.f32.mrf.mxu1 }
 0x321   : > { %v2397_v4 = vmax.f32 %v2265_v48, 0.0  ;;  %v2366_v55 = vadd.f32 %v2365_v44, %v2317_v24 }
 0x322   : > { %v2321_v14 = vpop.f32.mrf.mxu0 }
 0x323   : > { %v2417_v28 = vpack.c.bf16 %v2397_v4, %v2395_v16  ;;  %v2400_v52 = vmax.f32 %v2366_v55, 0.0  ;;  %v2322_v56 = vadd.f32 %v2321_v14, %v5400_v61 }
 0x325   : > { %2588 = vmatmul.bf16.gmra.mxu2 %v2417_v28 }
 0x326   : > { %v2267_v7 = vpop.f32.mrf.mxu3 }
 0x327   : > { %v2268_v3 = vadd.f32 %v2267_v7, %v2219_v22 }
 0x328   : > { %v2367_v60 = vpop.f32.mrf.mxu1 }
 0x329   : > { %v2368_v21 = vadd.f32 %v2367_v60, %v2319_v6  ;;  %v2399_v10 = vmax.f32 %v2268_v3, 0.0 }
 0x32a   : > { %v2323_v58 = vpop.f32.mrf.mxu0 }
 0x32b   : > { %v2402_v11 = vmax.f32 %v2368_v21, 0.0  ;;  %v2324_v43 = vadd.f32 %v2323_v58, %v5400_v61 }
 0x32d   : > { %v2420_v18 = vpack.c.bf16 %v2402_v11, %v2400_v52 }
 0x32e   : > { %v2269_v39 = vpop.f32.mrf.mxu3 }
 0x32f   : > { %v2270_v20 = vadd.f32 %v2269_v39, %v2221_v41  ;;  %2642 = vmatmul.bf16.gmra.mxu3 %v2420_v18 }
 0x330   : > { %v2370_v49 = vpop.f32.mrf.mxu1 }
 0x331   : > { %v2401_v53 = vmax.f32 %v2270_v20, 0.0  ;;  %v2371_v12 = vadd.f32 %v2370_v49, %v2322_v56 }
 0x333   : > { %v2419_v37 = vpack.c.bf16 %v2401_v53, %v2399_v10  ;;  %v2404_v45 = vmax.f32 %v2371_v12, 0.0 }
 0x335   : > { %2593 = vmatmul.bf16.gmra.mxu2 %v2419_v37 }
 0x336   : > { %v2272_v13 = vpop.f32.mrf.mxu3 }
 0x337   : > { %v2273_v62 = vadd.f32 %v2272_v13, %v2224_v30 }
 0x338   : > { %v2372_v63 = vpop.f32.mrf.mxu1 }
 0x339   : > { %v2373_v33 = vadd.f32 %v2372_v63, %v2324_v43  ;;  %v2403_v59 = vmax.f32 %v2273_v62, 0.0 }
 0x33b   : > { %v2406_v51 = vmax.f32 %v2373_v33, 0.0 }
 0x33d   : > { %v2422_v54 = vpack.c.bf16 %v2406_v51, %v2404_v45 }
 0x33e   : > { %v2274_v9 = vpop.f32.mrf.mxu3 }
 0x33f   : > { %v2275_v38 = vadd.f32 %v2274_v9, %v2226_v25  ;;  %2647 = vmatmul.bf16.gmra.mxu3 %v2422_v54 }
 0x341   : > { %v2405_v34 = vmax.f32 %v2275_v38, 0.0 }
 0x343   : > { %v2421_v61 = vpack.c.bf16 %v2405_v34, %v2403_v59 }
 0x345   : > { %2598 = vmatmul.bf16.gmra.mxu2 %v2421_v61 }
 0x352   : > { %v2613_v42 = vpop.f32.mrf.mxu3 }
 0x358   : > { %v2564_v2 = vpop.f32.mrf.mxu2 }
 0x359   : > { %v2565_v32 = vadd.f32 %v5440_v8, %v2564_v2 }
 0x35a   : > { %v2615_v15 = vpop.f32.mrf.mxu3 }
 0x35b   : > { %v2614_v17 = vadd.f32 %v2613_v42, %v2565_v32 }
 0x35d   : > { %2653 = vst [vmem:[%s5445_s14] sm:$0xff] %v2614_v17 }
 0x360   : > { %v2566_v35 = vpop.f32.mrf.mxu2 }
 0x361   : > { %v2567_v23 = vadd.f32 %v5440_v8, %v2566_v35 }
 0x362   : > { %v2618_v57 = vpop.f32.mrf.mxu3 }
 0x363   : > { %v2616_v36 = vadd.f32 %v2615_v15, %v2567_v23 }
 0x365   : > { %2654 = vst [vmem:[%s5445_s14 + $0x8] sm:$0xff] %v2616_v36 }
 0x368   : > { %v2569_v5 = vpop.f32.mrf.mxu2 }
 0x369   : > { %v2570_v1 = vadd.f32 %v5440_v8, %v2569_v5 }
 0x36a   : > { %v2620_v47 = vpop.f32.mrf.mxu3 }
 0x36b   : > { %v2619_v46 = vadd.f32 %v2618_v57, %v2570_v1 }
 0x36d   : > { %2655 = vst [vmem:[%s5445_s14 + $0x10] sm:$0xff] %v2619_v46 }
 0x370   : > { %v2571_v27 = vpop.f32.mrf.mxu2 }
 0x371   : > { %v2572_v19 = vadd.f32 %v5440_v8, %v2571_v27 }
 0x372   : > { %v2623_v0 = vpop.f32.mrf.mxu3 }
 0x373   : > { %v2621_v50 = vadd.f32 %v2620_v47, %v2572_v19 }
 0x375   : > { %2656 = vst [vmem:[%s5445_s14 + $0x18] sm:$0xff] %v2621_v50 }
 0x378   : > { %v2574_v48 = vpop.f32.mrf.mxu2 }
 0x379   : > { %v2575_v40 = vadd.f32 %v5440_v8, %v2574_v48 }
 0x37a   : > { %v2625_v44 = vpop.f32.mrf.mxu3 }
 0x37b   : > { %v2624_v16 = vadd.f32 %v2623_v0, %v2575_v40 }
 0x37d   : > { %2657 = vst [vmem:[%s5445_s14 + $0x20] sm:$0xff] %v2624_v16 }
 0x380   : > { %v2576_v4 = vpop.f32.mrf.mxu2 }
 0x381   : > { %v2577_v28 = vadd.f32 %v5440_v8, %v2576_v4 }
 0x382   : > { %v2628_v24 = vpop.f32.mrf.mxu3 }
 0x383   : > { %v2626_v29 = vadd.f32 %v2625_v44, %v2577_v28 }
 0x385   : > { %2658 = vst [vmem:[%s5445_s14 + $0x28] sm:$0xff] %v2626_v29 }
 0x388   : > { %v2579_v7 = vpop.f32.mrf.mxu2 }
 0x389   : > { %v2580_v6 = vadd.f32 %v5440_v8, %v2579_v7 }
 0x38a   : > { %v2630_v55 = vpop.f32.mrf.mxu3 }
 0x38b   : > { %v2629_v60 = vadd.f32 %v2628_v24, %v2580_v6 }
 0x38d   : > { %2659 = vst [vmem:[%s5445_s14 + $0x30] sm:$0xff] %v2629_v60 }
 0x390   : > { %v2581_v21 = vpop.f32.mrf.mxu2 }
 0x391   : > { %v2582_v14 = vadd.f32 %v5440_v8, %v2581_v21 }
 0x392   : > { %v2633_v22 = vpop.f32.mrf.mxu3 }
 0x393   : > { %v2631_v52 = vadd.f32 %v2630_v55, %v2582_v14 }
 0x395   : > { %2660 = vst [vmem:[%s5445_s14 + $0x38] sm:$0xff] %v2631_v52 }
 0x398   : > { %v2584_v11 = vpop.f32.mrf.mxu2 }
 0x399   : > { %v2585_v41 = vadd.f32 %v5440_v8, %v2584_v11 }
 0x39a   : > { %v2635_v3 = vpop.f32.mrf.mxu3 }
 0x39b   : > { %v2634_v18 = vadd.f32 %v2633_v22, %v2585_v41 }
 0x39d   : > { %2661 = vst [vmem:[%s5445_s14 + $0x40] sm:$0xff] %v2634_v18 }
 0x3a0   : > { %v2586_v39 = vpop.f32.mrf.mxu2 }
 0x3a1   : > { %v2587_v20 = vadd.f32 %v5440_v8, %v2586_v39 }
 0x3a2   : > { %v2638_v26 = vpop.f32.mrf.mxu3 }
 0x3a3   : > { %v2636_v49 = vadd.f32 %v2635_v3, %v2587_v20 }
 0x3a5   : > { %2662 = vst [vmem:[%s5445_s14 + $0x48] sm:$0xff] %v2636_v49 }
 0x3a8   : > { %v2589_v10 = vpop.f32.mrf.mxu2 }
 0x3a9   : > { %v2590_v53 = vadd.f32 %v5440_v8, %v2589_v10 }
 0x3aa   : > { %v2640_v37 = vpop.f32.mrf.mxu3 }
 0x3ab   : > { %v2639_v58 = vadd.f32 %v2638_v26, %v2590_v53 }
 0x3ad   : > { %2663 = vst [vmem:[%s5445_s14 + $0x50] sm:$0xff] %v2639_v58 }
 0x3b0   : > { %v2591_v56 = vpop.f32.mrf.mxu2 }
 0x3b1   : > { %v2592_v13 = vadd.f32 %v5440_v8, %v2591_v56 }
 0x3b2   : > { %v2643_v12 = vpop.f32.mrf.mxu3 }
 0x3b3   : > { %v2641_v43 = vadd.f32 %v2640_v37, %v2592_v13 }
 0x3b5   : > { %2664 = vst [vmem:[%s5445_s14 + $0x58] sm:$0xff] %v2641_v43 }
 0x3b8   : > { %v2594_v63 = vpop.f32.mrf.mxu2 }
 0x3b9   : > { %v2595_v33 = vadd.f32 %v5440_v8, %v2594_v63 }
 0x3ba   : > { %v2645_v30 = vpop.f32.mrf.mxu3 }
 0x3bb   : > { %v2644_v31 = vadd.f32 %v2643_v12, %v2595_v33 }
 0x3bd   : > { %2665 = vst [vmem:[%s5445_s14 + $0x60] sm:$0xff] %v2644_v31 }
 0x3c0   : > { %v2596_v45 = vpop.f32.mrf.mxu2 }
 0x3c1   : > { %v2597_v51 = vadd.f32 %v5440_v8, %v2596_v45 }
 0x3c2   : > { %v2648_v62 = vpop.f32.mrf.mxu3 }
 0x3c3   : > { %v2646_v25 = vadd.f32 %v2645_v30, %v2597_v51 }
 0x3c5   : > { %2666 = vst [vmem:[%s5445_s14 + $0x68] sm:$0xff] %v2646_v25 }
 0x3c8   : > { %v2599_v54 = vpop.f32.mrf.mxu2 }
 0x3c9   : > { %v2600_v9 = vadd.f32 %v5440_v8, %v2599_v54 }
 0x3ca   : > { %v2650_v61 = vpop.f32.mrf.mxu3 }
 0x3cb   : > { %v2649_v38 = vadd.f32 %v2648_v62, %v2600_v9 }
 0x3cd   : > { %2667 = vst [vmem:[%s5445_s14 + $0x70] sm:$0xff] %v2649_v38 }
 0x3d0   : > { %v2601_v59 = vpop.f32.mrf.mxu2 }
 0x3d1   : > { %v2602_v34 = vadd.f32 %v5440_v8, %v2601_v59 }
 0x3d3   : > { %v2651_v42 = vadd.f32 %v2650_v61, %v2602_v34 }
 0x3d5   : > { %2668 = vst [vmem:[%s5445_s14 + $0x78] sm:$0xff] %v2651_v42 }
 0x3d6   : > { %3857 = shalt.err (!%p3854_p3)
}
 0x3d7   : > { %s3894_s20 = smov 128   ;;  %s3895_s14 = smov 8  }
 0x3d8   : > { %3787 = dma.vmem_to_hbm [thread:$0]  (%p3974_p5), %s2683_s15, 2048, %s2685_s16, %s2670_s18, %s3894_s20, %s3894_s20, %s3895_s14  }
 0x3d9 PF: > { %p3793_p4 = scmp.ge.s32.totalorder %s3892_s27, 2  ;;  %s2699_s9 = sand.u32 1, %s3880_s24  }
 0x3da   : > { %s2700_s8 = scalar_lea.sflag [#allocation3], %s2699_s9 }
 0x3db   : > { %p3790_p7 = pnand %p3793_p4, %p3978_p6 }
 0x3dd   : > { %p3791_p8 = pneg %p3790_p7 }
 0x3df   : > { %3875 = dma.done.wait (%p3791_p8), %s2700_s8, 2048  }
 0x3e0   : > { %3877 = vsyncadd (%p3791_p8), %s2700_s8, 4294965248  ;;  %p17_p9 = scmp.ge.s32.totalorder %s3961_s30, 4   ;;  %s5576_s24 = smov %s3884_s25 }
 0x3e1   : > { %s5577_s25 = smov %s3888_s26  ;;  %s5578_s26 = smov %s3972_s10 }
 0x3e2   : > { %s5579_s27 = smov %s3961_s30  ;;  %19 = sbr.rel (!%p17_p9) target bundleno = 3 (0x3), region = 83 }
 0x3e7   :  { %2706 = vsyncpa [#allocation3], 1 }
 0x3e8   :  { %2708 = vsyncpa [#allocation3 + $0x1], 1 }

</bundles_post_ra>
